<compile_context>
chip_gen: v7x
topology: tpu7x:2x2x1
jax: 0.10.0
libtpu: 0.0.40
codegen_flags: <defaults>
</compile_context>

<pallas_src>
import jax
import jax.numpy as jnp
from jax import lax
from jax.experimental import pallas as pl
from jax.experimental.pallas import tpu as pltpu


# ----------------------------------------------------------------------------
# Fused kernel: one grid step == one image of the batch.
# ----------------------------------------------------------------------------
def _encoder_block_kernel(xe_ref, xo_ref, w1_ref, b1_ref, w2_ref, b2_ref,
                          w3r_ref, b3r_ref, out_ref,
                          xp_ref, h1p_ref, t9_ref, hx_ref):
    H = xe_ref.shape[1]
    Wp = xe_ref.shape[2]
    Cin = xe_ref.shape[3]
    Hp = H // 2
    M = Hp * Wp                       # pooled pixels per image (row-major i,j)
    cmidp = w1_ref.shape[1]           # mid channels padded to 128-lane slot
    pad = (h1p_ref.shape[0] - M) // 2  # zero rows above/below flattened h1

    # ---------------- MaxPool2d(2, 2): 4-way elementwise max ----------------
    for i in range(Hp):
        r0 = jnp.maximum(xe_ref[0, 2 * i, :, :], xo_ref[0, 2 * i, :, :])
        r1 = jnp.maximum(xe_ref[0, 2 * i + 1, :, :], xo_ref[0, 2 * i + 1, :, :])
        xp_ref[pl.ds(i * Wp, Wp), :] = jnp.maximum(r0, r1)
    xp = xp_ref[...]                                          # (M, Cin) f32

    # ---- Conv2d 1x1 (in->mid) + folded BN + ReLU : one bf16 MXU matmul -----
    h1 = jnp.dot(xp.astype(jnp.bfloat16), w1_ref[...],
                 preferred_element_type=jnp.float32) + b1_ref[0]
    h1 = jnp.maximum(h1, 0.0)                                 # (M, cmidp) f32

    # ---- Conv2d 3x3 pad=1 + folded BN + ReLU : single matmul, K = 9*cmidp --
    # Flattened h1 with zero guard rows; a (dh, dw) tap is a contiguous read
    # at row offset dh*Wp + dw, with wrapped columns masked via an iota mask.
    h1p_ref[...] = jnp.zeros(h1p_ref.shape, h1p_ref.dtype)
    h1p_ref[pl.ds(pad, M), :] = h1
    col = lax.broadcasted_iota(jnp.int32, (M, cmidp), 0) % Wp
    for t in range(9):                       # t = kh*3 + kw  (matches w2 rows)
        dh, dw = t // 3 - 1, t % 3 - 1
        tap = h1p_ref[pl.ds(pad + dh * Wp + dw, M), :]
        if dw == 1:
            tap = jnp.where(col < Wp - 1, tap, 0.0)
        elif dw == -1:
            tap = jnp.where(col > 0, tap, 0.0)
        # lane-aligned 128-wide slot store into the tap matrix
        t9_ref[:, pl.ds(t * cmidp, cmidp)] = tap.astype(jnp.bfloat16)
    h2 = jnp.dot(t9_ref[...], w2_ref[...],
                 preferred_element_type=jnp.float32) + b2_ref[0]
    h2 = jnp.maximum(h2, 0.0)                                 # (M, cmidp) f32

    # ---- final 1x1 conv fused with residual 1x1 conv (+folded BN): one matmul
    hx_ref[...] = jnp.zeros(hx_ref.shape, hx_ref.dtype)
    hx_ref[:, pl.ds(0, cmidp)] = h2.astype(jnp.bfloat16)
    hx_ref[:, pl.ds(cmidp, Cin)] = xp.astype(jnp.bfloat16)
    out = jnp.dot(hx_ref[...], w3r_ref[...],
                  preferred_element_type=jnp.float32) + b3r_ref[0]
    out_ref[0] = jnp.maximum(out, 0.0).astype(out_ref.dtype)


# ----------------------------------------------------------------------------
# Wrapper: BN folding + channel padding (XLA, once per call) and pallas_call.
# ----------------------------------------------------------------------------
@jax.jit
def encoder_block_forward(x_nchw, params):
    N, Cin, H, W = x_nchw.shape
    assert H % 2 == 0 and W % 2 == 0
    Hp, Wp = H // 2, W // 2
    M = Hp * Wp
    Cmid = params["w1"].shape[1]
    Cout = params["w3"].shape[1]

    rup = lambda c: ((c + 127) // 128) * 128      # pad channels to lane slots
    cinp, cmidp, coutp = rup(Cin), rup(Cmid), rup(Cout)
    pad_rows = ((Wp + 8) // 8) * 8                # >= Wp + 1, multiple of 8

    f32, bf16 = jnp.float32, jnp.bfloat16

    # ---- fold BatchNorm (inference) into conv weights / biases, pad, cast --
    w1 = params["w1"] * params["s1"]                               # (Cin,Cmid)
    b1 = params["b1"] * params["s1"] + params["sh1"]
    w2 = params["w2"] * params["s2"][None]                         # (9,Cmid,Cmid)
    b2 = params["b2"] * params["s2"] + params["sh2"]
    wr = params["wr"] * params["sr"]                               # (Cin,Cout)
    b3r = params["b3"] + params["br"] * params["sr"] + params["shr"]

    w1p = jnp.pad(w1, ((0, 0), (0, cmidp - Cmid))).astype(bf16)
    b1p = jnp.pad(b1, ((0, 0), (0, cmidp - Cmid))).astype(f32)
    w2p = jnp.pad(w2, ((0, 0), (0, cmidp - Cmid), (0, cmidp - Cmid)))
    w2p = w2p.reshape(9 * cmidp, cmidp).astype(bf16)
    b2p = jnp.pad(b2, ((0, 0), (0, cmidp - Cmid))).astype(f32)
    w3p = jnp.pad(params["w3"], ((0, cmidp - Cmid), (0, coutp - Cout)))
    wrp = jnp.pad(wr, ((0, cinp - Cin), (0, coutp - Cout)))
    w3rp = jnp.concatenate([w3p, wrp], axis=0).astype(bf16)   # (cmidp+cinp, coutp)
    b3rp = jnp.pad(b3r, ((0, 0), (0, coutp - Cout))).astype(f32)

    # ---- layout plumbing only: NCHW -> NHWC, W split by parity so in-kernel
    #      pooling reads stay contiguous (same bytes as one layout transpose).
    x_nhwc = jnp.transpose(x_nchw.astype(f32), (0, 2, 3, 1))
    x_even = x_nhwc[:, :, 0::2, :]                            # (N, H, Wp, Cin)
    x_odd = x_nhwc[:, :, 1::2, :]

    out_pad = pl.pallas_call(
        _encoder_block_kernel,
        out_shape=jax.ShapeDtypeStruct((N, M, coutp), jnp.float32),
        grid=(N,),
        in_specs=[
            pl.BlockSpec((1, H, Wp, Cin), lambda n: (n, 0, 0, 0)),
            pl.BlockSpec((1, H, Wp, Cin), lambda n: (n, 0, 0, 0)),
            pl.BlockSpec((Cin, cmidp), lambda n: (0, 0)),
            pl.BlockSpec((1, cmidp), lambda n: (0, 0)),
            pl.BlockSpec((9 * cmidp, cmidp), lambda n: (0, 0)),
            pl.BlockSpec((1, cmidp), lambda n: (0, 0)),
            pl.BlockSpec((cmidp + cinp, coutp), lambda n: (0, 0)),
            pl.BlockSpec((1, coutp), lambda n: (0, 0)),
        ],
        out_specs=pl.BlockSpec((1, M, coutp), lambda n: (n, 0, 0)),
        scratch_shapes=[
            pltpu.VMEM((M, Cin), jnp.float32),                   # pooled xp
            pltpu.VMEM((M + 2 * pad_rows, cmidp), jnp.float32),  # padded h1
            pltpu.VMEM((M, 9 * cmidp), jnp.bfloat16),            # 3x3 taps
            pltpu.VMEM((M, cmidp + cinp), jnp.bfloat16),         # [h2 | xp]
        ],
        compiler_params=pltpu.CompilerParams(
            dimension_semantics=("parallel",),
            vmem_limit_bytes=32 * 1024 * 1024,
        ),
    )(x_even, x_odd, w1p, b1p, w2p, b2p, w3rp, b3rp)

    out = out_pad[:, :, :Cout].reshape(N, Hp, Wp, Cout)
    return jnp.transpose(out, (0, 3, 1, 2))                   # NCHW


# ----------------------------------------------------------------------------
# Deterministic parameter construction (shapes from the module's __init__)
# ----------------------------------------------------------------------------
def make_params(key, in_channels, out_channels, eps=1e-5):
    mid = in_channels
    ks = jax.random.split(key, 20)

    def nrm(k, shape, scale=0.3):
        return scale * jax.random.normal(k, shape, jnp.float32)

    def bn_fold(kg, kb, km, kv, c):
        gamma = 1.0 + 0.1 * jax.random.normal(kg, (c,), jnp.float32)
        beta = 0.1 * jax.random.normal(kb, (c,), jnp.float32)
        mean = 0.1 * jax.random.normal(km, (c,), jnp.float32)
        var = jax.random.uniform(kv, (c,), jnp.float32, minval=0.5, maxval=1.5)
        scale = gamma / jnp.sqrt(var + eps)
        shift = beta - mean * scale
        return scale.reshape(1, c), shift.reshape(1, c)

    s1, sh1 = bn_fold(ks[0], ks[1], ks[2], ks[3], mid)
    s2, sh2 = bn_fold(ks[4], ks[5], ks[6], ks[7], mid)
    sr, shr = bn_fold(ks[8], ks[9], ks[10], ks[11], out_channels)

    return dict(
        w1=nrm(ks[12], (in_channels, mid)),        # Conv2d 1x1 (in->mid)
        b1=nrm(ks[13], (1, mid), 0.1),
        s1=s1, sh1=sh1,
        w2=nrm(ks[14], (9, mid, mid)),             # Conv2d 3x3, [kh*3+kw, ci, co]
        b2=nrm(ks[15], (1, mid), 0.1),
        s2=s2, sh2=sh2,
        w3=nrm(ks[16], (mid, out_channels)),       # Conv2d 1x1 (mid->out)
        b3=nrm(ks[17], (1, out_channels), 0.1),
        wr=nrm(ks[18], (in_channels, out_channels)),  # residual Conv2d 1x1
        br=nrm(ks[19], (1, out_channels), 0.1),
        sr=sr, shr=shr,
    )


# ----------------------------------------------------------------------------
# Pure-JAX reference for validation
# ----------------------------------------------------------------------------
def reference_forward(x_nchw, p):
    N, Cin, H, W = x_nchw.shape
    Hp, Wp = H // 2, W // 2
    x = jnp.transpose(x_nchw, (0, 2, 3, 1))
    xp = x.reshape(N, Hp, 2, Wp, 2, Cin).max(axis=(2, 4))

    def conv1x1(t, w, b):
        return jnp.einsum("nhwc,cd->nhwd", t, w) + b.reshape(1, 1, 1, -1)

    def bn(t, s, sh):
        return t * s.reshape(1, 1, 1, -1) + sh.reshape(1, 1, 1, -1)

    h1 = jax.nn.relu(bn(conv1x1(xp, p["w1"], p["b1"]), p["s1"], p["sh1"]))
    cmid = h1.shape[-1]
    w2_hwio = p["w2"].reshape(3, 3, cmid, cmid)
    h2 = lax.conv_general_dilated(h1, w2_hwio, (1, 1), "SAME",
                                  dimension_numbers=("NHWC", "HWIO", "NHWC"))
    h2 = jax.nn.relu(bn(h2 + p["b2"].reshape(1, 1, 1, -1), p["s2"], p["sh2"]))
    h3 = conv1x1(h2, p["w3"], p["b3"])
    r = bn(conv1x1(xp, p["wr"], p["br"]), p["sr"], p["shr"])
    out = jax.nn.relu(h3 + r)
    return jnp.transpose(out, (0, 3, 1, 2))


if __name__ == "__main__":
    key = jax.random.PRNGKey(0)
    kx, kp = jax.random.split(key)
    N, Cin, Cout, H, W = 2, 4, 8, 16, 16

    x = jax.random.normal(kx, (N, Cin, H, W), jnp.float32)
    params = make_params(kp, Cin, Cout)

    out = jax.block_until_ready(encoder_block_forward(x, params))
    ref = reference_forward(x, params)

    assert out.shape == (N, Cout, H // 2, W // 2), out.shape
    max_err = float(jnp.max(jnp.abs(out - ref)))
    # bf16 matmuls with f32 accumulation -> loosened tolerance vs f32 reference
    assert jnp.allclose(out, ref, atol=5e-2, rtol=5e-2), max_err

    print("KERNEL_OK")
</pallas_src>

<mosaic_0001>
module attributes {stable_mosaic.version = 11 : i64} {
  func.func @_encoder_block_kernel(%arg0: i32, %arg1: memref<1x16x8x4xf32, #tpu.memory_space<vmem>>, %arg2: memref<1x16x8x4xf32, #tpu.memory_space<vmem>>, %arg3: memref<4x128xbf16, #tpu.memory_space<vmem>>, %arg4: memref<1x128xf32, #tpu.memory_space<vmem>>, %arg5: memref<1152x128xbf16, #tpu.memory_space<vmem>>, %arg6: memref<1x128xf32, #tpu.memory_space<vmem>>, %arg7: memref<256x128xbf16, #tpu.memory_space<vmem>>, %arg8: memref<1x128xf32, #tpu.memory_space<vmem>>, %arg9: memref<1x64x128xf32, #tpu.memory_space<vmem>>, %arg10: memref<64x4xf32, #tpu.memory_space<vmem>>, %arg11: memref<96x128xf32, #tpu.memory_space<vmem>>, %arg12: memref<64x1152xbf16, #tpu.memory_space<vmem>>, %arg13: memref<64x256xbf16, #tpu.memory_space<vmem>>) attributes {dimension_semantics = [#tpu.dimension_semantics<parallel>], iteration_bounds = array<i64: 2>, scalar_prefetch = 0 : i64, scratch_operands = 4 : i64, tpu.core_type = #tpu.core_type<tc>, window_params = [{transform_indices = @transform_0, window_bounds = array<i64: 1, 16, 8, 4>}, {transform_indices = @transform_1, window_bounds = array<i64: 1, 16, 8, 4>}, {pipeline_mode = #tpu.pipeline_mode<synchronous>, transform_indices = @transform_2, window_bounds = array<i64: 4, 128>}, {pipeline_mode = #tpu.pipeline_mode<synchronous>, transform_indices = @transform_3, window_bounds = array<i64: 1, 128>}, {pipeline_mode = #tpu.pipeline_mode<synchronous>, transform_indices = @transform_4, window_bounds = array<i64: 1152, 128>}, {pipeline_mode = #tpu.pipeline_mode<synchronous>, transform_indices = @transform_5, window_bounds = array<i64: 1, 128>}, {pipeline_mode = #tpu.pipeline_mode<synchronous>, transform_indices = @transform_6, window_bounds = array<i64: 256, 128>}, {pipeline_mode = #tpu.pipeline_mode<synchronous>, transform_indices = @transform_7, window_bounds = array<i64: 1, 128>}, {transform_indices = @transform_8, window_bounds = array<i64: 1, 64, 128>}]} {
    %c0 = arith.constant 0 : index
    %c0_0 = arith.constant 0 : index
    %c0_1 = arith.constant 0 : index
    %c0_2 = arith.constant 0 : index
    %0 = vector.load %arg1[%c0, %c0_0, %c0_1, %c0_2] : memref<1x16x8x4xf32, #tpu.memory_space<vmem>>, vector<1x1x8x4xf32>
    %1 = vector.shape_cast %0 : vector<1x1x8x4xf32> to vector<8x4xf32>
    %c0_3 = arith.constant 0 : index
    %c0_4 = arith.constant 0 : index
    %c0_5 = arith.constant 0 : index
    %c0_6 = arith.constant 0 : index
    %2 = vector.load %arg2[%c0_3, %c0_4, %c0_5, %c0_6] : memref<1x16x8x4xf32, #tpu.memory_space<vmem>>, vector<1x1x8x4xf32>
    %3 = vector.shape_cast %2 : vector<1x1x8x4xf32> to vector<8x4xf32>
    %4 = arith.maximumf %1, %3 : vector<8x4xf32>
    %c0_7 = arith.constant 0 : index
    %c1 = arith.constant 1 : index
    %c0_8 = arith.constant 0 : index
    %c0_9 = arith.constant 0 : index
    %5 = vector.load %arg1[%c0_7, %c1, %c0_8, %c0_9] : memref<1x16x8x4xf32, #tpu.memory_space<vmem>>, vector<1x1x8x4xf32>
    %6 = vector.shape_cast %5 : vector<1x1x8x4xf32> to vector<8x4xf32>
    %c0_10 = arith.constant 0 : index
    %c1_11 = arith.constant 1 : index
    %c0_12 = arith.constant 0 : index
    %c0_13 = arith.constant 0 : index
    %7 = vector.load %arg2[%c0_10, %c1_11, %c0_12, %c0_13] : memref<1x16x8x4xf32, #tpu.memory_space<vmem>>, vector<1x1x8x4xf32>
    %8 = vector.shape_cast %7 : vector<1x1x8x4xf32> to vector<8x4xf32>
    %9 = arith.maximumf %6, %8 : vector<8x4xf32>
    %10 = arith.maximumf %4, %9 : vector<8x4xf32>
    %c0_14 = arith.constant 0 : index
    %c0_15 = arith.constant 0 : index
    %11 = vector.load %arg10[%c0_14, %c0_15] : memref<64x4xf32, #tpu.memory_space<vmem>>, vector<8x4xf32>
    tpu.vector_store %arg10[%c0_14, %c0_15], %10 {strides = array<i32>} : memref<64x4xf32, #tpu.memory_space<vmem>>, vector<8x4xf32>,
    %c0_16 = arith.constant 0 : index
    %c2 = arith.constant 2 : index
    %c0_17 = arith.constant 0 : index
    %c0_18 = arith.constant 0 : index
    %12 = vector.load %arg1[%c0_16, %c2, %c0_17, %c0_18] : memref<1x16x8x4xf32, #tpu.memory_space<vmem>>, vector<1x1x8x4xf32>
    %13 = vector.shape_cast %12 : vector<1x1x8x4xf32> to vector<8x4xf32>
    %c0_19 = arith.constant 0 : index
    %c2_20 = arith.constant 2 : index
    %c0_21 = arith.constant 0 : index
    %c0_22 = arith.constant 0 : index
    %14 = vector.load %arg2[%c0_19, %c2_20, %c0_21, %c0_22] : memref<1x16x8x4xf32, #tpu.memory_space<vmem>>, vector<1x1x8x4xf32>
    %15 = vector.shape_cast %14 : vector<1x1x8x4xf32> to vector<8x4xf32>
    %16 = arith.maximumf %13, %15 : vector<8x4xf32>
    %c0_23 = arith.constant 0 : index
    %c3 = arith.constant 3 : index
    %c0_24 = arith.constant 0 : index
    %c0_25 = arith.constant 0 : index
    %17 = vector.load %arg1[%c0_23, %c3, %c0_24, %c0_25] : memref<1x16x8x4xf32, #tpu.memory_space<vmem>>, vector<1x1x8x4xf32>
    %18 = vector.shape_cast %17 : vector<1x1x8x4xf32> to vector<8x4xf32>
    %c0_26 = arith.constant 0 : index
    %c3_27 = arith.constant 3 : index
    %c0_28 = arith.constant 0 : index
    %c0_29 = arith.constant 0 : index
    %19 = vector.load %arg2[%c0_26, %c3_27, %c0_28, %c0_29] : memref<1x16x8x4xf32, #tpu.memory_space<vmem>>, vector<1x1x8x4xf32>
    %20 = vector.shape_cast %19 : vector<1x1x8x4xf32> to vector<8x4xf32>
    %21 = arith.maximumf %18, %20 : vector<8x4xf32>
    %22 = arith.maximumf %16, %21 : vector<8x4xf32>
    %c8 = arith.constant 8 : index
    %c0_30 = arith.constant 0 : index
    %23 = vector.load %arg10[%c8, %c0_30] : memref<64x4xf32, #tpu.memory_space<vmem>>, vector<8x4xf32>
    tpu.vector_store %arg10[%c8, %c0_30], %22 {strides = array<i32>} : memref<64x4xf32, #tpu.memory_space<vmem>>, vector<8x4xf32>,
    %c0_31 = arith.constant 0 : index
    %c4 = arith.constant 4 : index
    %c0_32 = arith.constant 0 : index
    %c0_33 = arith.constant 0 : index
    %24 = vector.load %arg1[%c0_31, %c4, %c0_32, %c0_33] : memref<1x16x8x4xf32, #tpu.memory_space<vmem>>, vector<1x1x8x4xf32>
    %25 = vector.shape_cast %24 : vector<1x1x8x4xf32> to vector<8x4xf32>
    %c0_34 = arith.constant 0 : index
    %c4_35 = arith.constant 4 : index
    %c0_36 = arith.constant 0 : index
    %c0_37 = arith.constant 0 : index
    %26 = vector.load %arg2[%c0_34, %c4_35, %c0_36, %c0_37] : memref<1x16x8x4xf32, #tpu.memory_space<vmem>>, vector<1x1x8x4xf32>
    %27 = vector.shape_cast %26 : vector<1x1x8x4xf32> to vector<8x4xf32>
    %28 = arith.maximumf %25, %27 : vector<8x4xf32>
    %c0_38 = arith.constant 0 : index
    %c5 = arith.constant 5 : index
    %c0_39 = arith.constant 0 : index
    %c0_40 = arith.constant 0 : index
    %29 = vector.load %arg1[%c0_38, %c5, %c0_39, %c0_40] : memref<1x16x8x4xf32, #tpu.memory_space<vmem>>, vector<1x1x8x4xf32>
    %30 = vector.shape_cast %29 : vector<1x1x8x4xf32> to vector<8x4xf32>
    %c0_41 = arith.constant 0 : index
    %c5_42 = arith.constant 5 : index
    %c0_43 = arith.constant 0 : index
    %c0_44 = arith.constant 0 : index
    %31 = vector.load %arg2[%c0_41, %c5_42, %c0_43, %c0_44] : memref<1x16x8x4xf32, #tpu.memory_space<vmem>>, vector<1x1x8x4xf32>
    %32 = vector.shape_cast %31 : vector<1x1x8x4xf32> to vector<8x4xf32>
    %33 = arith.maximumf %30, %32 : vector<8x4xf32>
    %34 = arith.maximumf %28, %33 : vector<8x4xf32>
    %c16 = arith.constant 16 : index
    %c0_45 = arith.constant 0 : index
    %35 = vector.load %arg10[%c16, %c0_45] : memref<64x4xf32, #tpu.memory_space<vmem>>, vector<8x4xf32>
    tpu.vector_store %arg10[%c16, %c0_45], %34 {strides = array<i32>} : memref<64x4xf32, #tpu.memory_space<vmem>>, vector<8x4xf32>,
    %c0_46 = arith.constant 0 : index
    %c6 = arith.constant 6 : index
    %c0_47 = arith.constant 0 : index
    %c0_48 = arith.constant 0 : index
    %36 = vector.load %arg1[%c0_46, %c6, %c0_47, %c0_48] : memref<1x16x8x4xf32, #tpu.memory_space<vmem>>, vector<1x1x8x4xf32>
    %37 = vector.shape_cast %36 : vector<1x1x8x4xf32> to vector<8x4xf32>
    %c0_49 = arith.constant 0 : index
    %c6_50 = arith.constant 6 : index
    %c0_51 = arith.constant 0 : index
    %c0_52 = arith.constant 0 : index
    %38 = vector.load %arg2[%c0_49, %c6_50, %c0_51, %c0_52] : memref<1x16x8x4xf32, #tpu.memory_space<vmem>>, vector<1x1x8x4xf32>
    %39 = vector.shape_cast %38 : vector<1x1x8x4xf32> to vector<8x4xf32>
    %40 = arith.maximumf %37, %39 : vector<8x4xf32>
    %c0_53 = arith.constant 0 : index
    %c7 = arith.constant 7 : index
    %c0_54 = arith.constant 0 : index
    %c0_55 = arith.constant 0 : index
    %41 = vector.load %arg1[%c0_53, %c7, %c0_54, %c0_55] : memref<1x16x8x4xf32, #tpu.memory_space<vmem>>, vector<1x1x8x4xf32>
    %42 = vector.shape_cast %41 : vector<1x1x8x4xf32> to vector<8x4xf32>
    %c0_56 = arith.constant 0 : index
    %c7_57 = arith.constant 7 : index
    %c0_58 = arith.constant 0 : index
    %c0_59 = arith.constant 0 : index
    %43 = vector.load %arg2[%c0_56, %c7_57, %c0_58, %c0_59] : memref<1x16x8x4xf32, #tpu.memory_space<vmem>>, vector<1x1x8x4xf32>
    %44 = vector.shape_cast %43 : vector<1x1x8x4xf32> to vector<8x4xf32>
    %45 = arith.maximumf %42, %44 : vector<8x4xf32>
    %46 = arith.maximumf %40, %45 : vector<8x4xf32>
    %c24 = arith.constant 24 : index
    %c0_60 = arith.constant 0 : index
    %47 = vector.load %arg10[%c24, %c0_60] : memref<64x4xf32, #tpu.memory_space<vmem>>, vector<8x4xf32>
    tpu.vector_store %arg10[%c24, %c0_60], %46 {strides = array<i32>} : memref<64x4xf32, #tpu.memory_space<vmem>>, vector<8x4xf32>,
    %c0_61 = arith.constant 0 : index
    %c8_62 = arith.constant 8 : index
    %c0_63 = arith.constant 0 : index
    %c0_64 = arith.constant 0 : index
    %48 = vector.load %arg1[%c0_61, %c8_62, %c0_63, %c0_64] : memref<1x16x8x4xf32, #tpu.memory_space<vmem>>, vector<1x1x8x4xf32>
    %49 = vector.shape_cast %48 : vector<1x1x8x4xf32> to vector<8x4xf32>
    %c0_65 = arith.constant 0 : index
    %c8_66 = arith.constant 8 : index
    %c0_67 = arith.constant 0 : index
    %c0_68 = arith.constant 0 : index
    %50 = vector.load %arg2[%c0_65, %c8_66, %c0_67, %c0_68] : memref<1x16x8x4xf32, #tpu.memory_space<vmem>>, vector<1x1x8x4xf32>
    %51 = vector.shape_cast %50 : vector<1x1x8x4xf32> to vector<8x4xf32>
    %52 = arith.maximumf %49, %51 : vector<8x4xf32>
    %c0_69 = arith.constant 0 : index
    %c9 = arith.constant 9 : index
    %c0_70 = arith.constant 0 : index
    %c0_71 = arith.constant 0 : index
    %53 = vector.load %arg1[%c0_69, %c9, %c0_70, %c0_71] : memref<1x16x8x4xf32, #tpu.memory_space<vmem>>, vector<1x1x8x4xf32>
    %54 = vector.shape_cast %53 : vector<1x1x8x4xf32> to vector<8x4xf32>
    %c0_72 = arith.constant 0 : index
    %c9_73 = arith.constant 9 : index
    %c0_74 = arith.constant 0 : index
    %c0_75 = arith.constant 0 : index
    %55 = vector.load %arg2[%c0_72, %c9_73, %c0_74, %c0_75] : memref<1x16x8x4xf32, #tpu.memory_space<vmem>>, vector<1x1x8x4xf32>
    %56 = vector.shape_cast %55 : vector<1x1x8x4xf32> to vector<8x4xf32>
    %57 = arith.maximumf %54, %56 : vector<8x4xf32>
    %58 = arith.maximumf %52, %57 : vector<8x4xf32>
    %c32 = arith.constant 32 : index
    %c0_76 = arith.constant 0 : index
    %59 = vector.load %arg10[%c32, %c0_76] : memref<64x4xf32, #tpu.memory_space<vmem>>, vector<8x4xf32>
    tpu.vector_store %arg10[%c32, %c0_76], %58 {strides = array<i32>} : memref<64x4xf32, #tpu.memory_space<vmem>>, vector<8x4xf32>,
    %c0_77 = arith.constant 0 : index
    %c10 = arith.constant 10 : index
    %c0_78 = arith.constant 0 : index
    %c0_79 = arith.constant 0 : index
    %60 = vector.load %arg1[%c0_77, %c10, %c0_78, %c0_79] : memref<1x16x8x4xf32, #tpu.memory_space<vmem>>, vector<1x1x8x4xf32>
    %61 = vector.shape_cast %60 : vector<1x1x8x4xf32> to vector<8x4xf32>
    %c0_80 = arith.constant 0 : index
    %c10_81 = arith.constant 10 : index
    %c0_82 = arith.constant 0 : index
    %c0_83 = arith.constant 0 : index
    %62 = vector.load %arg2[%c0_80, %c10_81, %c0_82, %c0_83] : memref<1x16x8x4xf32, #tpu.memory_space<vmem>>, vector<1x1x8x4xf32>
    %63 = vector.shape_cast %62 : vector<1x1x8x4xf32> to vector<8x4xf32>
    %64 = arith.maximumf %61, %63 : vector<8x4xf32>
    %c0_84 = arith.constant 0 : index
    %c11 = arith.constant 11 : index
    %c0_85 = arith.constant 0 : index
    %c0_86 = arith.constant 0 : index
    %65 = vector.load %arg1[%c0_84, %c11, %c0_85, %c0_86] : memref<1x16x8x4xf32, #tpu.memory_space<vmem>>, vector<1x1x8x4xf32>
    %66 = vector.shape_cast %65 : vector<1x1x8x4xf32> to vector<8x4xf32>
    %c0_87 = arith.constant 0 : index
    %c11_88 = arith.constant 11 : index
    %c0_89 = arith.constant 0 : index
    %c0_90 = arith.constant 0 : index
    %67 = vector.load %arg2[%c0_87, %c11_88, %c0_89, %c0_90] : memref<1x16x8x4xf32, #tpu.memory_space<vmem>>, vector<1x1x8x4xf32>
    %68 = vector.shape_cast %67 : vector<1x1x8x4xf32> to vector<8x4xf32>
    %69 = arith.maximumf %66, %68 : vector<8x4xf32>
    %70 = arith.maximumf %64, %69 : vector<8x4xf32>
    %c40 = arith.constant 40 : index
    %c0_91 = arith.constant 0 : index
    %71 = vector.load %arg10[%c40, %c0_91] : memref<64x4xf32, #tpu.memory_space<vmem>>, vector<8x4xf32>
    tpu.vector_store %arg10[%c40, %c0_91], %70 {strides = array<i32>} : memref<64x4xf32, #tpu.memory_space<vmem>>, vector<8x4xf32>,
    %c0_92 = arith.constant 0 : index
    %c12 = arith.constant 12 : index
    %c0_93 = arith.constant 0 : index
    %c0_94 = arith.constant 0 : index
    %72 = vector.load %arg1[%c0_92, %c12, %c0_93, %c0_94] : memref<1x16x8x4xf32, #tpu.memory_space<vmem>>, vector<1x1x8x4xf32>
    %73 = vector.shape_cast %72 : vector<1x1x8x4xf32> to vector<8x4xf32>
    %c0_95 = arith.constant 0 : index
    %c12_96 = arith.constant 12 : index
    %c0_97 = arith.constant 0 : index
    %c0_98 = arith.constant 0 : index
    %74 = vector.load %arg2[%c0_95, %c12_96, %c0_97, %c0_98] : memref<1x16x8x4xf32, #tpu.memory_space<vmem>>, vector<1x1x8x4xf32>
    %75 = vector.shape_cast %74 : vector<1x1x8x4xf32> to vector<8x4xf32>
    %76 = arith.maximumf %73, %75 : vector<8x4xf32>
    %c0_99 = arith.constant 0 : index
    %c13 = arith.constant 13 : index
    %c0_100 = arith.constant 0 : index
    %c0_101 = arith.constant 0 : index
    %77 = vector.load %arg1[%c0_99, %c13, %c0_100, %c0_101] : memref<1x16x8x4xf32, #tpu.memory_space<vmem>>, vector<1x1x8x4xf32>
    %78 = vector.shape_cast %77 : vector<1x1x8x4xf32> to vector<8x4xf32>
    %c0_102 = arith.constant 0 : index
    %c13_103 = arith.constant 13 : index
    %c0_104 = arith.constant 0 : index
    %c0_105 = arith.constant 0 : index
    %79 = vector.load %arg2[%c0_102, %c13_103, %c0_104, %c0_105] : memref<1x16x8x4xf32, #tpu.memory_space<vmem>>, vector<1x1x8x4xf32>
    %80 = vector.shape_cast %79 : vector<1x1x8x4xf32> to vector<8x4xf32>
    %81 = arith.maximumf %78, %80 : vector<8x4xf32>
    %82 = arith.maximumf %76, %81 : vector<8x4xf32>
    %c48 = arith.constant 48 : index
    %c0_106 = arith.constant 0 : index
    %83 = vector.load %arg10[%c48, %c0_106] : memref<64x4xf32, #tpu.memory_space<vmem>>, vector<8x4xf32>
    tpu.vector_store %arg10[%c48, %c0_106], %82 {strides = array<i32>} : memref<64x4xf32, #tpu.memory_space<vmem>>, vector<8x4xf32>,
    %c0_107 = arith.constant 0 : index
    %c14 = arith.constant 14 : index
    %c0_108 = arith.constant 0 : index
    %c0_109 = arith.constant 0 : index
    %84 = vector.load %arg1[%c0_107, %c14, %c0_108, %c0_109] : memref<1x16x8x4xf32, #tpu.memory_space<vmem>>, vector<1x1x8x4xf32>
    %85 = vector.shape_cast %84 : vector<1x1x8x4xf32> to vector<8x4xf32>
    %c0_110 = arith.constant 0 : index
    %c14_111 = arith.constant 14 : index
    %c0_112 = arith.constant 0 : index
    %c0_113 = arith.constant 0 : index
    %86 = vector.load %arg2[%c0_110, %c14_111, %c0_112, %c0_113] : memref<1x16x8x4xf32, #tpu.memory_space<vmem>>, vector<1x1x8x4xf32>
    %87 = vector.shape_cast %86 : vector<1x1x8x4xf32> to vector<8x4xf32>
    %88 = arith.maximumf %85, %87 : vector<8x4xf32>
    %c0_114 = arith.constant 0 : index
    %c15 = arith.constant 15 : index
    %c0_115 = arith.constant 0 : index
    %c0_116 = arith.constant 0 : index
    %89 = vector.load %arg1[%c0_114, %c15, %c0_115, %c0_116] : memref<1x16x8x4xf32, #tpu.memory_space<vmem>>, vector<1x1x8x4xf32>
    %90 = vector.shape_cast %89 : vector<1x1x8x4xf32> to vector<8x4xf32>
    %c0_117 = arith.constant 0 : index
    %c15_118 = arith.constant 15 : index
    %c0_119 = arith.constant 0 : index
    %c0_120 = arith.constant 0 : index
    %91 = vector.load %arg2[%c0_117, %c15_118, %c0_119, %c0_120] : memref<1x16x8x4xf32, #tpu.memory_space<vmem>>, vector<1x1x8x4xf32>
    %92 = vector.shape_cast %91 : vector<1x1x8x4xf32> to vector<8x4xf32>
    %93 = arith.maximumf %90, %92 : vector<8x4xf32>
    %94 = arith.maximumf %88, %93 : vector<8x4xf32>
    %c56 = arith.constant 56 : index
    %c0_121 = arith.constant 0 : index
    %95 = vector.load %arg10[%c56, %c0_121] : memref<64x4xf32, #tpu.memory_space<vmem>>, vector<8x4xf32>
    tpu.vector_store %arg10[%c56, %c0_121], %94 {strides = array<i32>} : memref<64x4xf32, #tpu.memory_space<vmem>>, vector<8x4xf32>,
    %c0_122 = arith.constant 0 : index
    %c0_123 = arith.constant 0 : index
    %96 = vector.load %arg10[%c0_122, %c0_123] : memref<64x4xf32, #tpu.memory_space<vmem>>, vector<64x4xf32>
    %97 = arith.truncf %96 : vector<64x4xf32> to vector<64x4xbf16>
    %c0_124 = arith.constant 0 : index
    %c0_125 = arith.constant 0 : index
    %98 = vector.load %arg3[%c0_124, %c0_125] : memref<4x128xbf16, #tpu.memory_space<vmem>>, vector<4x128xbf16>
    %cst = arith.constant dense<0.000000e+00> : vector<64x128xf32>
    %99 = tpu.matmul %97, %98, %cst {dimension_numbers = #tpu.dot_dimension_numbers<[1], [0], [0], [1], [0, 0, 1, 1], [], []>} : vector<64x4xbf16>, vector<4x128xbf16>, vector<64x128xf32> -> vector<64x128xf32>
    %c0_126 = arith.constant 0 : index
    %c0_127 = arith.constant 0 : index
    %100 = vector.load %arg4[%c0_126, %c0_127] : memref<1x128xf32, #tpu.memory_space<vmem>>, vector<1x128xf32>
    %101 = vector.shape_cast %100 : vector<1x128xf32> to vector<128xf32>
    %102 = vector.shape_cast %101 : vector<128xf32> to vector<1x128xf32>
    %103 = vector.broadcast %102 : vector<1x128xf32> to vector<64x128xf32>
    %104 = arith.addf %99, %103 : vector<64x128xf32>
    %cst_128 = arith.constant 0.000000e+00 : f32
    %105 = vector.broadcast %cst_128 : f32 to vector<64x128xf32>
    %106 = arith.maximumf %104, %105 : vector<64x128xf32>
    %cst_129 = arith.constant 0.000000e+00 : f32
    %107 = vector.broadcast %cst_129 : f32 to vector<96x128xf32>
    %c0_130 = arith.constant 0 : index
    %c0_131 = arith.constant 0 : index
    %108 = vector.load %arg11[%c0_130, %c0_131] : memref<96x128xf32, #tpu.memory_space<vmem>>, vector<96x128xf32>
    tpu.vector_store %arg11[%c0_130, %c0_131], %107 {strides = array<i32>} : memref<96x128xf32, #tpu.memory_space<vmem>>, vector<96x128xf32>,
    %c16_132 = arith.constant 16 : index
    %c0_133 = arith.constant 0 : index
    %109 = vector.load %arg11[%c16_132, %c0_133] : memref<96x128xf32, #tpu.memory_space<vmem>>, vector<64x128xf32>
    tpu.vector_store %arg11[%c16_132, %c0_133], %106 {strides = array<i32>} : memref<96x128xf32, #tpu.memory_space<vmem>>, vector<64x128xf32>,
    %110 = tpu.iota {dimensions = array<i32: 0>} : vector<64x128xi32>
    %c8_i32 = arith.constant 8 : i32
    %c0_i32 = arith.constant 0 : i32
    %111 = arith.cmpi eq, %c8_i32, %c0_i32 : i32
    %c1_i32 = arith.constant 1 : i32
    %112 = arith.select %111, %c1_i32, %c8_i32 : i32
    %113 = vector.broadcast %112 : i32 to vector<64x128xi32>
    %114 = arith.remsi %110, %113 : vector<64x128xi32>
    %c0_i32_134 = arith.constant 0 : i32
    %115 = vector.broadcast %c0_i32_134 : i32 to vector<64x128xi32>
    %116 = arith.cmpi ne, %114, %115 : vector<64x128xi32>
    %c0_i32_135 = arith.constant 0 : i32
    %117 = vector.broadcast %c0_i32_135 : i32 to vector<64x128xi32>
    %118 = arith.cmpi slt, %114, %117 : vector<64x128xi32>
    %c0_i32_136 = arith.constant 0 : i32
    %119 = arith.cmpi slt, %112, %c0_i32_136 : i32
    %120 = vector.broadcast %119 : i1 to vector<64x128xi1>
    %121 = vector.broadcast %120 : vector<64x128xi1> to vector<64x128xi1>
    %122 = arith.xori %118, %121 : vector<64x128xi1>
    %123 = arith.andi %122, %116 : vector<64x128xi1>
    %124 = vector.broadcast %112 : i32 to vector<64x128xi32>
    %125 = arith.addi %114, %124 : vector<64x128xi32>
    %126 = arith.select %123, %125, %114 : vector<64x128xi1>, vector<64x128xi32>
    %c7_137 = arith.constant 7 : index
    %c0_138 = arith.constant 0 : index
    %127 = vector.load %arg11[%c7_137, %c0_138] : memref<96x128xf32, #tpu.memory_space<vmem>>, vector<64x128xf32>
    %c0_i32_139 = arith.constant 0 : i32
    %128 = vector.broadcast %c0_i32_139 : i32 to vector<64x128xi32>
    %129 = arith.cmpi sgt, %126, %128 : vector<64x128xi32>
    %cst_140 = arith.constant 0.000000e+00 : f32
    %130 = vector.broadcast %cst_140 : f32 to vector<64x128xf32>
    %131 = arith.select %129, %127, %130 : vector<64x128xi1>, vector<64x128xf32>
    %132 = arith.truncf %131 : vector<64x128xf32> to vector<64x128xbf16>
    %c0_141 = arith.constant 0 : index
    %c0_142 = arith.constant 0 : index
    %133 = vector.load %arg12[%c0_141, %c0_142] : memref<64x1152xbf16, #tpu.memory_space<vmem>>, vector<64x128xbf16>
    tpu.vector_store %arg12[%c0_141, %c0_142], %132 {strides = array<i32>} : memref<64x1152xbf16, #tpu.memory_space<vmem>>, vector<64x128xbf16>,
    %c8_143 = arith.constant 8 : index
    %c0_144 = arith.constant 0 : index
    %134 = vector.load %arg11[%c8_143, %c0_144] : memref<96x128xf32, #tpu.memory_space<vmem>>, vector<64x128xf32>
    %135 = arith.truncf %134 : vector<64x128xf32> to vector<64x128xbf16>
    %c0_145 = arith.constant 0 : index
    %c128 = arith.constant 128 : index
    %136 = vector.load %arg12[%c0_145, %c128] : memref<64x1152xbf16, #tpu.memory_space<vmem>>, vector<64x128xbf16>
    tpu.vector_store %arg12[%c0_145, %c128], %135 {strides = array<i32>} : memref<64x1152xbf16, #tpu.memory_space<vmem>>, vector<64x128xbf16>,
    %c9_146 = arith.constant 9 : index
    %c0_147 = arith.constant 0 : index
    %137 = vector.load %arg11[%c9_146, %c0_147] : memref<96x128xf32, #tpu.memory_space<vmem>>, vector<64x128xf32>
    %c7_i32 = arith.constant 7 : i32
    %138 = vector.broadcast %c7_i32 : i32 to vector<64x128xi32>
    %139 = arith.cmpi slt, %126, %138 : vector<64x128xi32>
    %cst_148 = arith.constant 0.000000e+00 : f32
    %140 = vector.broadcast %cst_148 : f32 to vector<64x128xf32>
    %141 = arith.select %139, %137, %140 : vector<64x128xi1>, vector<64x128xf32>
    %142 = arith.truncf %141 : vector<64x128xf32> to vector<64x128xbf16>
    %c0_149 = arith.constant 0 : index
    %c256 = arith.constant 256 : index
    %143 = vector.load %arg12[%c0_149, %c256] : memref<64x1152xbf16, #tpu.memory_space<vmem>>, vector<64x128xbf16>
    tpu.vector_store %arg12[%c0_149, %c256], %142 {strides = array<i32>} : memref<64x1152xbf16, #tpu.memory_space<vmem>>, vector<64x128xbf16>,
    %c15_150 = arith.constant 15 : index
    %c0_151 = arith.constant 0 : index
    %144 = vector.load %arg11[%c15_150, %c0_151] : memref<96x128xf32, #tpu.memory_space<vmem>>, vector<64x128xf32>
    %c0_i32_152 = arith.constant 0 : i32
    %145 = vector.broadcast %c0_i32_152 : i32 to vector<64x128xi32>
    %146 = arith.cmpi sgt, %126, %145 : vector<64x128xi32>
    %cst_153 = arith.constant 0.000000e+00 : f32
    %147 = vector.broadcast %cst_153 : f32 to vector<64x128xf32>
    %148 = arith.select %146, %144, %147 : vector<64x128xi1>, vector<64x128xf32>
    %149 = arith.truncf %148 : vector<64x128xf32> to vector<64x128xbf16>
    %c0_154 = arith.constant 0 : index
    %c384 = arith.constant 384 : index
    %150 = vector.load %arg12[%c0_154, %c384] : memref<64x1152xbf16, #tpu.memory_space<vmem>>, vector<64x128xbf16>
    tpu.vector_store %arg12[%c0_154, %c384], %149 {strides = array<i32>} : memref<64x1152xbf16, #tpu.memory_space<vmem>>, vector<64x128xbf16>,
    %c16_155 = arith.constant 16 : index
    %c0_156 = arith.constant 0 : index
    %151 = vector.load %arg11[%c16_155, %c0_156] : memref<96x128xf32, #tpu.memory_space<vmem>>, vector<64x128xf32>
    %152 = arith.truncf %151 : vector<64x128xf32> to vector<64x128xbf16>
    %c0_157 = arith.constant 0 : index
    %c512 = arith.constant 512 : index
    %153 = vector.load %arg12[%c0_157, %c512] : memref<64x1152xbf16, #tpu.memory_space<vmem>>, vector<64x128xbf16>
    tpu.vector_store %arg12[%c0_157, %c512], %152 {strides = array<i32>} : memref<64x1152xbf16, #tpu.memory_space<vmem>>, vector<64x128xbf16>,
    %c17 = arith.constant 17 : index
    %c0_158 = arith.constant 0 : index
    %154 = vector.load %arg11[%c17, %c0_158] : memref<96x128xf32, #tpu.memory_space<vmem>>, vector<64x128xf32>
    %c7_i32_159 = arith.constant 7 : i32
    %155 = vector.broadcast %c7_i32_159 : i32 to vector<64x128xi32>
    %156 = arith.cmpi slt, %126, %155 : vector<64x128xi32>
    %cst_160 = arith.constant 0.000000e+00 : f32
    %157 = vector.broadcast %cst_160 : f32 to vector<64x128xf32>
    %158 = arith.select %156, %154, %157 : vector<64x128xi1>, vector<64x128xf32>
    %159 = arith.truncf %158 : vector<64x128xf32> to vector<64x128xbf16>
    %c0_161 = arith.constant 0 : index
    %c640 = arith.constant 640 : index
    %160 = vector.load %arg12[%c0_161, %c640] : memref<64x1152xbf16, #tpu.memory_space<vmem>>, vector<64x128xbf16>
    tpu.vector_store %arg12[%c0_161, %c640], %159 {strides = array<i32>} : memref<64x1152xbf16, #tpu.memory_space<vmem>>, vector<64x128xbf16>,
    %c23 = arith.constant 23 : index
    %c0_162 = arith.constant 0 : index
    %161 = vector.load %arg11[%c23, %c0_162] : memref<96x128xf32, #tpu.memory_space<vmem>>, vector<64x128xf32>
    %c0_i32_163 = arith.constant 0 : i32
    %162 = vector.broadcast %c0_i32_163 : i32 to vector<64x128xi32>
    %163 = arith.cmpi sgt, %126, %162 : vector<64x128xi32>
    %cst_164 = arith.constant 0.000000e+00 : f32
    %164 = vector.broadcast %cst_164 : f32 to vector<64x128xf32>
    %165 = arith.select %163, %161, %164 : vector<64x128xi1>, vector<64x128xf32>
    %166 = arith.truncf %165 : vector<64x128xf32> to vector<64x128xbf16>
    %c0_165 = arith.constant 0 : index
    %c768 = arith.constant 768 : index
    %167 = vector.load %arg12[%c0_165, %c768] : memref<64x1152xbf16, #tpu.memory_space<vmem>>, vector<64x128xbf16>
    tpu.vector_store %arg12[%c0_165, %c768], %166 {strides = array<i32>} : memref<64x1152xbf16, #tpu.memory_space<vmem>>, vector<64x128xbf16>,
    %c24_166 = arith.constant 24 : index
    %c0_167 = arith.constant 0 : index
    %168 = vector.load %arg11[%c24_166, %c0_167] : memref<96x128xf32, #tpu.memory_space<vmem>>, vector<64x128xf32>
    %169 = arith.truncf %168 : vector<64x128xf32> to vector<64x128xbf16>
    %c0_168 = arith.constant 0 : index
    %c896 = arith.constant 896 : index
    %170 = vector.load %arg12[%c0_168, %c896] : memref<64x1152xbf16, #tpu.memory_space<vmem>>, vector<64x128xbf16>
    tpu.vector_store %arg12[%c0_168, %c896], %169 {strides = array<i32>} : memref<64x1152xbf16, #tpu.memory_space<vmem>>, vector<64x128xbf16>,
    %c25 = arith.constant 25 : index
    %c0_169 = arith.constant 0 : index
    %171 = vector.load %arg11[%c25, %c0_169] : memref<96x128xf32, #tpu.memory_space<vmem>>, vector<64x128xf32>
    %c7_i32_170 = arith.constant 7 : i32
    %172 = vector.broadcast %c7_i32_170 : i32 to vector<64x128xi32>
    %173 = arith.cmpi slt, %126, %172 : vector<64x128xi32>
    %cst_171 = arith.constant 0.000000e+00 : f32
    %174 = vector.broadcast %cst_171 : f32 to vector<64x128xf32>
    %175 = arith.select %173, %171, %174 : vector<64x128xi1>, vector<64x128xf32>
    %176 = arith.truncf %175 : vector<64x128xf32> to vector<64x128xbf16>
    %c0_172 = arith.constant 0 : index
    %c1024 = arith.constant 1024 : index
    %177 = vector.load %arg12[%c0_172, %c1024] : memref<64x1152xbf16, #tpu.memory_space<vmem>>, vector<64x128xbf16>
    tpu.vector_store %arg12[%c0_172, %c1024], %176 {strides = array<i32>} : memref<64x1152xbf16, #tpu.memory_space<vmem>>, vector<64x128xbf16>,
    %c0_173 = arith.constant 0 : index
    %c0_174 = arith.constant 0 : index
    %178 = vector.load %arg12[%c0_173, %c0_174] : memref<64x1152xbf16, #tpu.memory_space<vmem>>, vector<64x1152xbf16>
    %c0_175 = arith.constant 0 : index
    %c0_176 = arith.constant 0 : index
    %179 = vector.load %arg5[%c0_175, %c0_176] : memref<1152x128xbf16, #tpu.memory_space<vmem>>, vector<1152x128xbf16>
    %cst_177 = arith.constant dense<0.000000e+00> : vector<64x128xf32>
    %180 = tpu.matmul %178, %179, %cst_177 {dimension_numbers = #tpu.dot_dimension_numbers<[1], [0], [0], [1], [0, 0, 1, 1], [], []>} : vector<64x1152xbf16>, vector<1152x128xbf16>, vector<64x128xf32> -> vector<64x128xf32>
    %c0_178 = arith.constant 0 : index
    %c0_179 = arith.constant 0 : index
    %181 = vector.load %arg6[%c0_178, %c0_179] : memref<1x128xf32, #tpu.memory_space<vmem>>, vector<1x128xf32>
    %182 = vector.shape_cast %181 : vector<1x128xf32> to vector<128xf32>
    %183 = vector.shape_cast %182 : vector<128xf32> to vector<1x128xf32>
    %184 = vector.broadcast %183 : vector<1x128xf32> to vector<64x128xf32>
    %185 = arith.addf %180, %184 : vector<64x128xf32>
    %cst_180 = arith.constant 0.000000e+00 : f32
    %186 = vector.broadcast %cst_180 : f32 to vector<64x128xf32>
    %187 = arith.maximumf %185, %186 : vector<64x128xf32>
    %cst_181 = arith.constant 0.000000e+00 : bf16
    %188 = vector.broadcast %cst_181 : bf16 to vector<64x256xbf16>
    %c0_182 = arith.constant 0 : index
    %c0_183 = arith.constant 0 : index
    %189 = vector.load %arg13[%c0_182, %c0_183] : memref<64x256xbf16, #tpu.memory_space<vmem>>, vector<64x256xbf16>
    tpu.vector_store %arg13[%c0_182, %c0_183], %188 {strides = array<i32>} : memref<64x256xbf16, #tpu.memory_space<vmem>>, vector<64x256xbf16>,
    %190 = arith.truncf %187 : vector<64x128xf32> to vector<64x128xbf16>
    %c0_184 = arith.constant 0 : index
    %c0_185 = arith.constant 0 : index
    %191 = vector.load %arg13[%c0_184, %c0_185] : memref<64x256xbf16, #tpu.memory_space<vmem>>, vector<64x128xbf16>
    tpu.vector_store %arg13[%c0_184, %c0_185], %190 {strides = array<i32>} : memref<64x256xbf16, #tpu.memory_space<vmem>>, vector<64x128xbf16>,
    %192 = arith.truncf %96 : vector<64x4xf32> to vector<64x4xbf16>
    %c0_186 = arith.constant 0 : index
    %c128_187 = arith.constant 128 : index
    %193 = vector.load %arg13[%c0_186, %c128_187] : memref<64x256xbf16, #tpu.memory_space<vmem>>, vector<64x4xbf16>
    tpu.vector_store %arg13[%c0_186, %c128_187], %192 {strides = array<i32>} : memref<64x256xbf16, #tpu.memory_space<vmem>>, vector<64x4xbf16>,
    %c0_188 = arith.constant 0 : index
    %c0_189 = arith.constant 0 : index
    %194 = vector.load %arg13[%c0_188, %c0_189] : memref<64x256xbf16, #tpu.memory_space<vmem>>, vector<64x256xbf16>
    %c0_190 = arith.constant 0 : index
    %c0_191 = arith.constant 0 : index
    %195 = vector.load %arg7[%c0_190, %c0_191] : memref<256x128xbf16, #tpu.memory_space<vmem>>, vector<256x128xbf16>
    %cst_192 = arith.constant dense<0.000000e+00> : vector<64x128xf32>
    %196 = tpu.matmul %194, %195, %cst_192 {dimension_numbers = #tpu.dot_dimension_numbers<[1], [0], [0], [1], [0, 0, 1, 1], [], []>} : vector<64x256xbf16>, vector<256x128xbf16>, vector<64x128xf32> -> vector<64x128xf32>
    %c0_193 = arith.constant 0 : index
    %c0_194 = arith.constant 0 : index
    %197 = vector.load %arg8[%c0_193, %c0_194] : memref<1x128xf32, #tpu.memory_space<vmem>>, vector<1x128xf32>
    %198 = vector.shape_cast %197 : vector<1x128xf32> to vector<128xf32>
    %199 = vector.shape_cast %198 : vector<128xf32> to vector<1x128xf32>
    %200 = vector.broadcast %199 : vector<1x128xf32> to vector<64x128xf32>
    %201 = arith.addf %196, %200 : vector<64x128xf32>
    %cst_195 = arith.constant 0.000000e+00 : f32
    %202 = vector.broadcast %cst_195 : f32 to vector<64x128xf32>
    %203 = arith.maximumf %201, %202 : vector<64x128xf32>
    %c0_196 = arith.constant 0 : index
    %c0_197 = arith.constant 0 : index
    %c0_198 = arith.constant 0 : index
    %204 = vector.load %arg9[%c0_196, %c0_197, %c0_198] : memref<1x64x128xf32, #tpu.memory_space<vmem>>, vector<1x64x128xf32>
    %205 = vector.shape_cast %204 : vector<1x64x128xf32> to vector<64x128xf32>
    %206 = vector.shape_cast %203 : vector<64x128xf32> to vector<1x64x128xf32>
    tpu.vector_store %arg9[%c0_196, %c0_197, %c0_198], %206 {strides = array<i32>} : memref<1x64x128xf32, #tpu.memory_space<vmem>>, vector<1x64x128xf32>,
    return
  }
  func.func @transform_0(%arg0: i32) -> (i32, i32, i32, i32) {
    %c0_i32 = arith.constant 0 : i32
    %c0_i32_0 = arith.constant 0 : i32
    %c0_i32_1 = arith.constant 0 : i32
    %c0_i32_2 = arith.constant 0 : i32
    return %arg0, %c0_i32, %c0_i32_0, %c0_i32_1 : i32, i32, i32, i32
  }
  func.func @transform_1(%arg0: i32) -> (i32, i32, i32, i32) {
    %c0_i32 = arith.constant 0 : i32
    %c0_i32_0 = arith.constant 0 : i32
    %c0_i32_1 = arith.constant 0 : i32
    %c0_i32_2 = arith.constant 0 : i32
    return %arg0, %c0_i32, %c0_i32_0, %c0_i32_1 : i32, i32, i32, i32
  }
  func.func @transform_2(%arg0: i32) -> (i32, i32) {
    %c0_i32 = arith.constant 0 : i32
    %c0_i32_0 = arith.constant 0 : i32
    %c0_i32_1 = arith.constant 0 : i32
    return %c0_i32, %c0_i32_0 : i32, i32
  }
  func.func @transform_3(%arg0: i32) -> (i32, i32) {
    %c0_i32 = arith.constant 0 : i32
    %c0_i32_0 = arith.constant 0 : i32
    %c0_i32_1 = arith.constant 0 : i32
    return %c0_i32, %c0_i32_0 : i32, i32
  }
  func.func @transform_4(%arg0: i32) -> (i32, i32) {
    %c0_i32 = arith.constant 0 : i32
    %c0_i32_0 = arith.constant 0 : i32
    %c0_i32_1 = arith.constant 0 : i32
    return %c0_i32, %c0_i32_0 : i32, i32
  }
  func.func @transform_5(%arg0: i32) -> (i32, i32) {
    %c0_i32 = arith.constant 0 : i32
    %c0_i32_0 = arith.constant 0 : i32
    %c0_i32_1 = arith.constant 0 : i32
    return %c0_i32, %c0_i32_0 : i32, i32
  }
  func.func @transform_6(%arg0: i32) -> (i32, i32) {
    %c0_i32 = arith.constant 0 : i32
    %c0_i32_0 = arith.constant 0 : i32
    %c0_i32_1 = arith.constant 0 : i32
    return %c0_i32, %c0_i32_0 : i32, i32
  }
  func.func @transform_7(%arg0: i32) -> (i32, i32) {
    %c0_i32 = arith.constant 0 : i32
    %c0_i32_0 = arith.constant 0 : i32
    %c0_i32_1 = arith.constant 0 : i32
    return %c0_i32, %c0_i32_0 : i32, i32
  }
  func.func @transform_8(%arg0: i32) -> (i32, i32, i32) {
    %c0_i32 = arith.constant 0 : i32
    %c0_i32_0 = arith.constant 0 : i32
    %c0_i32_1 = arith.constant 0 : i32
    return %arg0, %c0_i32, %c0_i32_0 : i32, i32, i32
  }
}

</mosaic_0001>

<bundles_post_ra>
// kernel: encoder_block_forward.1
= control target key start
LH: loop header
LB: loop body
LE: loop exit
PB: predicated region body
PF: predicated region fallthrough
CT: control target
= control target key end

     0   :  { %s2745_s27 = smov 0   ;;  %s3349_s0 = inlined_call_operand.vmem [shape: f32[2,16,8,4], index: 0, kind: input, shape index: {}]   ;;  %s3350_s1 = inlined_call_operand.vmem [shape: f32[2,16,8,4], index: 1, kind: input, shape index: {}]   ;;  %s3351_s2 = inlined_call_operand.vmem [shape: bf16[4,128], index: 2, kind: input, shape index: {}]   ;;  %s3352_s3 = inlined_call_operand.vmem [shape: f32[1,128], index: 3, kind: input, shape index: {}]   ;;  %s3353_s4 = inlined_call_operand.vmem [shape: bf16[1152,128], index: 4, kind: input, shape index: {}]   ;;  %s3354_s5 = inlined_call_operand.vmem [shape: f32[1,128], index: 5, kind: input, shape index: {}]   ;;  %s3355_s6 = inlined_call_operand.vmem [shape: bf16[256,128], index: 6, kind: input, shape index: {}]   ;;  %s3356_s7 = inlined_call_operand.vmem [shape: f32[1,128], index: 7, kind: input, shape index: {}]   ;;  %s3357_s8 = inlined_call_operand.vmem [shape: f32[2,64,128], index: 8, kind: output, shape index: {}]  }
   0x1 LB: > { %s2127_s28 = sadd.s32 4294967295, %s2696_s27   ;;  %p2131_p0 = scmp.ge.s32.totalorder %s2696_s27, 1  ;;  %s2696_s27 = sphi %s2745_s27, %s18_s27  }
   0x2   : > { %p272_p1 = scmp.lt.s32.totalorder %s2696_s27, 3 }
   0x4   : > { %p273_p2 = pnand %p2131_p0, %p272_p1 }
   0x5   : > { %v434_v0 = vld [vmem:[%s3351_s2] sm:$0x3] (!%p273_p2)  ;;  %vm454_vm0 = vcmask (!%p273_p2), 1041408   ;;  %p311_p3 = scmp.lt.s32.totalorder (!%p273_p2), %s2127_s28, 1  ;;  %v2698_v2 = vmov (!%p273_p2), 0   ;;  %vm336_vm1 = vcmask (!%p273_p2), 31744  }
   0x6   : > { %276 = sbr.rel (%p273_p2) target bundleno = 794 (0x31a), region = 52  ;;  %2591 = vmatprep.subr.msk.bf16.mxu1 (!%p273_p2), %vm454_vm0, %v434_v0  ;;  %v456_v1 = vsel (!%p273_p2), %vm454_vm0, %v434_v0, 0  ;;  %1817 = vst [vmem:[#allocation5 + $0x8] sm:$0xff] (!%p273_p2), %v2698_v2  ;;  %1819 = vst [vmem:[#allocation5 + $0x18] sm:$0xff] (!%p273_p2), %v2698_v2  ;;  %v2602_v3 = vld [vmem:[%s3353_s4 + $0x40] sm:$0xff] (!%p273_p2)   ;;  %v2608_v61 = vld [vmem:[%s3353_s4 + $0xc8] sm:$0xff] (!%p273_p2)  }
   0x7   : > { %1821 = vst [vmem:[#allocation5 + $0x28] sm:$0xff] (!%p273_p2), %v2698_v2  ;;  %1823 = vst [vmem:[#allocation5 + $0x38] sm:$0xff] (!%p273_p2), %v2698_v2  ;;  %2558 = vmatpush3.bf16.msra.mxu1 (!%p273_p2), %v456_v1  ;;  %v2604_v4 = vld [vmem:[%s3353_s4 + $0xc0] sm:$0xff] (!%p273_p2)  }
   0x8   : > { %2345 = vmatprep.subr.bf16.mxu1 (!%p273_p2), %v2602_v3  ;;  %2385 = vmatprep.subr.bf16.mxu0 (!%p273_p2), %v2604_v4  ;;  %v2606_v5 = vld [vmem:[%s3353_s4 + $0x80] sm:$0xff] (!%p273_p2)   ;;  %v2610_v4 = vld [vmem:[%s3353_s4 + $0x88] sm:$0xff] (!%p273_p2)  }
   0x9   : > { %2386 = vmatpush3.bf16.msra.mxu0 (!%p273_p2), %v2606_v5  ;;  %v2603_v3 = vld [vmem:[%s3353_s4] sm:$0xff] (!%p273_p2)   ;;  %v2605_v5 = vld [vmem:[%s3353_s4 + $0x48] sm:$0xff] (!%p273_p2)  }
   0xa   : > { %2387 = vmatprep.subr.bf16.mxu0 (!%p273_p2), %v2608_v61 }
   0xd   : > { %s3385_s28 = smov (!%p311_p3, %s2127_s28), 1  ;;  %2388 = vmatpush3.bf16.msra.mxu0 %v2610_v4 }
   0xe   : > { %s2265_s13 = sshll.u32 %s3385_s28, 7  ;;  %s2267_s18 = sshll.u32 %s3385_s28, 6 }
   0xf   : > { %s2768_s16 = scalar_lea.vmem %s3349_s0, %s2265_s13  ;;  %s2773_s19 = scalar_lea.vmem %s3350_s1, %s2265_s13 }
  0x10   : > { %v327_v6 = vld [vmem:[%s2768_s16] sm:$0xff]  ;;  %v2138_v8 = vld [vmem:[%s2768_s16 + $0x8] sm:$0xff]  ;;  %v2140_v11 = vld [vmem:[%s2768_s16 + $0x10] sm:$0xff]  ;;  %s3336_s21 = scalar_lea.vmem %s3357_s8, %s2267_s18 }
  0x11   : > { %v328_v7 = vld [vmem:[%s2773_s19] sm:$0xff]  ;;  %v2139_v10 = vld [vmem:[%s2773_s19 + $0x8] sm:$0xff]  ;;  %v2141_v12 = vld [vmem:[%s2773_s19 + $0x10] sm:$0xff] }
  0x12   : > { %v329_v9 = vmax.f32 %v327_v6, %v328_v7  ;;  %v334_v13 = vmax.f32 %v2138_v8, %v2139_v10  ;;  %v342_v14 = vmax.f32 %v2140_v11, %v2141_v12  ;;  %v2142_v15 = vld [vmem:[%s2768_s16 + $0x18] sm:$0xff]  ;;  %v2144_v17 = vld [vmem:[%s2768_s16 + $0x20] sm:$0xff]  ;;  %v2146_v20 = vld [vmem:[%s2768_s16 + $0x28] sm:$0xff] }
  0x13   : > { %v2143_v16 = vld [vmem:[%s2773_s19 + $0x18] sm:$0xff]  ;;  %v2145_v19 = vld [vmem:[%s2773_s19 + $0x20] sm:$0xff]  ;;  %v2147_v21 = vld [vmem:[%s2773_s19 + $0x28] sm:$0xff] }
  0x14   : > { %v347_v18 = vmax.f32 %v2142_v15, %v2143_v16  ;;  %v335_v22 = vmax.f32 %v329_v9, %v334_v13  ;;  %v354_v23 = vmax.f32 %v2144_v17, %v2145_v19  ;;  %v359_v24 = vmax.f32 %v2146_v20, %v2147_v21  ;;  %v2148_v25 = vld [vmem:[%s2768_s16 + $0x30] sm:$0xff]  ;;  %v2150_v27 = vld [vmem:[%s2768_s16 + $0x38] sm:$0xff]  ;;  %v2152_v31 = vld [vmem:[%s2768_s16 + $0x40] sm:$0xff] }
  0x15   : > { %v2149_v26 = vld [vmem:[%s2773_s19 + $0x30] sm:$0xff]  ;;  %v2151_v30 = vld [vmem:[%s2773_s19 + $0x38] sm:$0xff]  ;;  %v2153_v32 = vld [vmem:[%s2773_s19 + $0x40] sm:$0xff] }
  0x16   : > { %v348_v28 = vmax.f32 %v342_v14, %v347_v18  ;;  %v366_v29 = vmax.f32 %v2148_v25, %v2149_v26  ;;  %337 = vst.msk [vmem:[#allocation2] sm:$0xff] %vm336_vm1, %v335_v22  ;;  %v360_v33 = vmax.f32 %v354_v23, %v359_v24  ;;  %v371_v34 = vmax.f32 %v2150_v27, %v2151_v30  ;;  %v2154_v36 = vld [vmem:[%s2768_s16 + $0x48] sm:$0xff]  ;;  %v2156_v38 = vld [vmem:[%s2768_s16 + $0x50] sm:$0xff]  ;;  %v2158_v41 = vld [vmem:[%s2768_s16 + $0x58] sm:$0xff] }
  0x17   : > { %v378_v35 = vmax.f32 %v2152_v31, %v2153_v32  ;;  %v2155_v37 = vld [vmem:[%s2773_s19 + $0x48] sm:$0xff]  ;;  %v2157_v40 = vld [vmem:[%s2773_s19 + $0x50] sm:$0xff]  ;;  %v2159_v42 = vld [vmem:[%s2773_s19 + $0x58] sm:$0xff] }
  0x18   : > { %349 = vst.msk [vmem:[#allocation2 + $0x8] sm:$0xff] %vm336_vm1, %v348_v28  ;;  %v383_v39 = vmax.f32 %v2154_v36, %v2155_v37  ;;  %361 = vst.msk [vmem:[#allocation2 + $0x10] sm:$0xff] %vm336_vm1, %v360_v33  ;;  %v372_v43 = vmax.f32 %v366_v29, %v371_v34  ;;  %v390_v44 = vmax.f32 %v2156_v38, %v2157_v40  ;;  %v2160_v46 = vld [vmem:[%s2768_s16 + $0x60] sm:$0xff]  ;;  %v2162_v48 = vld [vmem:[%s2768_s16 + $0x68] sm:$0xff]  ;;  %v2699_v29 = vmov 0.0  }
  0x19   : > { %v395_v45 = vmax.f32 %v2158_v41, %v2159_v42  ;;  %v2161_v47 = vld [vmem:[%s2773_s19 + $0x60] sm:$0xff]  ;;  %v2163_v51 = vld [vmem:[%s2773_s19 + $0x68] sm:$0xff]  ;;  %v2164_v52 = vld [vmem:[%s2768_s16 + $0x70] sm:$0xff]  ;;  %531 = vst [vmem:[#allocation3] sm:$0xff] %v2699_v29  ;;  %v551_v42 = vlaneseq }
  0x1a   : > { %v384_v49 = vmax.f32 %v378_v35, %v383_v39  ;;  %v402_v50 = vmax.f32 %v2160_v46, %v2161_v47  ;;  %v2165_v53 = vld [vmem:[%s2773_s19 + $0x70] sm:$0xff]  ;;  %373 = vst.msk [vmem:[#allocation2 + $0x18] sm:$0xff] %vm336_vm1, %v372_v43  ;;  %v407_v55 = vmax.f32 %v2162_v48, %v2163_v51  ;;  %v2166_v57 = vld [vmem:[%s2768_s16 + $0x78] sm:$0xff]  ;;  %v2607_v11 = vld [vmem:[%s3353_s4 + $0x8] sm:$0xff]  }
  0x1b   : > { %v396_v54 = vmax.f32 %v390_v44, %v395_v45  ;;  %v414_v56 = vmax.f32 %v2164_v52, %v2165_v53  ;;  %v2167_v58 = vld [vmem:[%s2773_s19 + $0x78] sm:$0xff]  ;;  %v2612_v7 = vld [vmem:[%s3353_s4 + $0xd0] sm:$0xff]   ;;  %v2617_v22 = vld [vmem:[%s3353_s4 + $0x60] sm:$0xff]   ;;  %532 = vst [vmem:[#allocation3 + $0x8] sm:$0xff] %v2699_v29  ;;  %v2926_v44 = vshrl.u32 %v551_v42, 7 }
  0x1c   : > { %385 = vst.msk [vmem:[#allocation2 + $0x20] sm:$0xff] %vm336_vm1, %v384_v49  ;;  %v419_v59 = vmax.f32 %v2166_v57, %v2167_v58  ;;  %v408_v60 = vmax.f32 %v402_v50, %v407_v55  ;;  %2389 = vmatprep.subr.bf16.mxu0 %v2612_v7  ;;  %v2614_v13 = vld [vmem:[%s3353_s4 + $0x90] sm:$0xff]   ;;  %v2616_v19 = vld [vmem:[%s3353_s4 + $0xd8] sm:$0xff]   ;;  %v2619_v24 = vld [vmem:[%s3353_s4 + $0x20] sm:$0xff]  }
  0x1d   : > { %397 = vst.msk [vmem:[#allocation2 + $0x28] sm:$0xff] %vm336_vm1, %v396_v54  ;;  %v422_v62 = vld [vmem:[#allocation2] sm:$0xff]  ;;  %v2609_v15 = vld [vmem:[%s3353_s4 + $0x50] sm:$0xff]   ;;  %2390 = vmatpush3.bf16.msra.mxu0 %v2614_v13  ;;  %v2613_v20 = vld [vmem:[%s3353_s4 + $0x58] sm:$0xff]   ;;  %v553_v50 = vadd.s32 8, %v2926_v44  ;;  %v564_v57 = vand.u32 7, %v2926_v44 }
  0x1e   : > { %v420_v63 = vmax.f32 %v414_v56, %v419_v59  ;;  %409 = vst.msk [vmem:[#allocation2 + $0x30] sm:$0xff] %vm336_vm1, %v408_v60  ;;  %v2611_v18 = vld [vmem:[%s3353_s4 + $0x10] sm:$0xff]   ;;  %2391 = vmatprep.subr.bf16.mxu0 %v2616_v19  ;;  %v2615_v21 = vld [vmem:[%s3353_s4 + $0x18] sm:$0xff]   ;;  %v2620_v25 = vld [vmem:[%s3353_s4 + $0xe0] sm:$0xff]   ;;  %v2938_v58 = vadd.s32 16, %v2926_v44 }
  0x1f   : > { %v423_v0 = vld [vmem:[#allocation2 + $0x8] sm:$0xff]  ;;  %v424_v2 = vld [vmem:[#allocation2 + $0x10] sm:$0xff]  ;;  %v2618_v23 = vld [vmem:[%s3353_s4 + $0x98] sm:$0xff]   ;;  %541 = vst [vmem:[#allocation3 + $0x50] sm:$0xff] %v2699_v29  ;;  %v571_v61 = vand.u32 7, %v553_v50  ;;  %vm664_vm2 = vcmp.gt.s32.totalorder %v564_v57, 0 }
  0x20   : > { %v430_v1 = vpack.c.bf16 %v423_v0, %v422_v62  ;;  %421 = vst.msk [vmem:[#allocation2 + $0x38] sm:$0xff] %vm336_vm1, %v420_v63  ;;  %v2621_v26 = vld [vmem:[%s3353_s4 + $0x68] sm:$0xff]   ;;  %v2622_v27 = vld [vmem:[%s3353_s4 + $0xa0] sm:$0xff]   ;;  %542 = vst [vmem:[#allocation3 + $0x58] sm:$0xff] %v2699_v29  ;;  %v2946_v62 = vadd.s32 24, %v2926_v44  ;;  %vm2964_vm4 = vcmp.lt.s32.totalorder %v564_v57, 7 }
  0x21   : > { %v425_v6 = vld [vmem:[#allocation2 + $0x18] sm:$0xff]  ;;  %2392 = vmatpush3.bf16.msra.mxu0 %v2618_v23  ;;  %v2623_v28 = vld [vmem:[%s3353_s4 + $0x28] sm:$0xff]   ;;  %v2625_v31 = vld [vmem:[%s3353_s4 + $0x70] sm:$0xff]   ;;  %vm665_vm3 = vcmp.gt.s32.totalorder %v571_v61, 0  ;;  %vm2968_vm5 = vcmp.lt.s32.totalorder %v571_v61, 7  ;;  %v2990_v23 = vadd.s32 40, %v2926_v44 }
  0x22   : > { %2559 = vmatprep.mubr.msk.bf16.mxu1 %vm336_vm1, %v430_v1  ;;  %1832 = vst.msk [vmem:[#allocation5 + $0x8] sm:$0xff] %vm336_vm1, %v430_v1  ;;  %v431_v8 = vpack.c.bf16 %v425_v6, %v424_v2  ;;  %2393 = vmatprep.subr.bf16.mxu0 %v2620_v25  ;;  %v2624_v30 = vld [vmem:[%s3353_s4 + $0xe8] sm:$0xff]   ;;  %v2627_v33 = vld [vmem:[%s3353_s4 + $0x30] sm:$0xff]   ;;  %v2629_v35 = vld [vmem:[%s3353_s4 + $0x78] sm:$0xff]  }
  0x23   : > { %v426_v9 = vld [vmem:[#allocation2 + $0x20] sm:$0xff]  ;;  %v2626_v32 = vld [vmem:[%s3353_s4 + $0xa8] sm:$0xff]   ;;  %v2628_v34 = vld [vmem:[%s3353_s4 + $0xf0] sm:$0xff]  }
  0x24   : > { %v427_v10 = vld [vmem:[#allocation2 + $0x28] sm:$0xff]  ;;  %2560 = vmatmul.mubr.msk.bf16.vlgmr.msra.gmra.mrb[0].mxu1 %vm336_vm1, %v431_v8  ;;  %1833 = vst.msk [vmem:[#allocation5 + $0x18] sm:$0xff] %vm336_vm1, %v431_v8  ;;  %v2630_v36 = vld [vmem:[%s3353_s4 + $0xb0] sm:$0xff]   ;;  %v2631_v37 = vld [vmem:[%s3353_s4 + $0x38] sm:$0xff]   ;;  %v585_v8 = vand.u32 7, %v2946_v62  ;;  %v558_v62 = vadd.s32 48, %v2926_v44 }
  0x25   : > { %v432_v12 = vpack.c.bf16 %v427_v10, %v426_v9  ;;  %v428_v14 = vld [vmem:[#allocation2 + $0x30] sm:$0xff]  ;;  %2346 = vmatpush3.bf16.msra.mxu1 %v2603_v3  ;;  %2394 = vmatpush3.bf16.msra.mxu0 %v2622_v27  ;;  %v2632_v38 = vld [vmem:[%s3353_s4 + $0xf8] sm:$0xff]   ;;  %v2634_v40 = vld [vmem:[%s3353_s4 + $0x140] sm:$0xff]  }
  0x26   : > { %2347 = vmatprep.subr.bf16.mxu1 %v2605_v5  ;;  %2395 = vmatprep.subr.bf16.mxu0 %v2624_v30  ;;  %v2633_v39 = vld [vmem:[%s3353_s4 + $0xb8] sm:$0xff]   ;;  %v2636_v41 = vld [vmem:[%s3353_s4 + $0x1c0] sm:$0xff]   ;;  %v578_v5 = vand.u32 7, %v2938_v58  ;;  %vm2975_vm6 = vmpackc.low %vm665_vm3, %vm664_vm2  ;;  %vm2995_vm8 = vcmp.gt.s32.totalorder %v585_v8, 0  ;;  %vm715_vm12 = vcmp.lt.s32.totalorder %v585_v8, 7 }
  0x27   : > { %2563 = vmatprep.mubr.msk.bf16.mxu1 %vm336_vm1, %v432_v12  ;;  %1834 = vst.msk [vmem:[#allocation5 + $0x28] sm:$0xff] %vm336_vm1, %v432_v12  ;;  %v429_v16 = vld [vmem:[#allocation2 + $0x38] sm:$0xff]  ;;  %v2168_v43 = vld [vmem:[%s3352_s3] ss:$0 sm:$0xff]  ;;  %v656_v12 = vld [vmem:[#allocation3 + $0x7] sm:$0xff] }
  0x28   : > { %v433_v17 = vpack.c.bf16 %v429_v16, %v428_v14  ;;  %vm2982_vm7 = vcmp.gt.s32.totalorder %v578_v5, 0  ;;  %v2637_v30 = vld [vmem:[%s3353_s4 + $0x148] sm:$0xff]   ;;  %vm3020_vm9 = vmpackc.low %vm2968_vm5, %vm2964_vm4  ;;  %vm3064_vm11 = vcmp.lt.s32.totalorder %v578_v5, 7  ;;  %v2645_v61 = vld [vmem:[%s3353_s4 + $0x158] sm:$0xff]  }
  0x29   : > { %2348 = vmatpush3.bf16.msra.mxu1 %v2607_v11  ;;  %2396 = vmatpush3.bf16.msra.mxu0 %v2626_v32  ;;  %vm3033_vm10 = vmpackc.low %vm2995_vm8, %vm2982_vm7  ;;  %v2640_v42 = vld [vmem:[%s3353_s4 + $0x1c8] sm:$0xff]   ;;  %v2647_v8 = vld [vmem:[%s3353_s4 + $0x118] sm:$0xff]  }
  0x2a   : > { %1835 = vst.msk [vmem:[#allocation5 + $0x38] sm:$0xff] %vm336_vm1, %v433_v17  ;;  %2349 = vmatprep.subr.bf16.mxu1 %v2609_v15  ;;  %2397 = vmatprep.subr.bf16.mxu0 %v2628_v34  ;;  %v2642_v50 = vld [vmem:[%s3353_s4 + $0x188] sm:$0xff]   ;;  %vm3087_vm15 = vmpackc.low %vm715_vm12, %vm3064_vm11  ;;  %v2650_v16 = vld [vmem:[%s3353_s4 + $0x198] sm:$0xff]  }
  0x2b   : > { %v2682_v5 = vld [vmem:[%s3355_s6 + $0x60] sm:$0xff]  }
  0x2c   : > { %2564 = vmatmul.mubr.msk.bf16.gmra.mrb[4].mxu1 %vm336_vm1, %v433_v17 }
  0x2d   : > { %2350 = vmatpush3.bf16.msra.mxu1 %v2611_v18  ;;  %2398 = vmatpush3.bf16.msra.mxu0 %v2630_v36 }
  0x2e   : > { %2351 = vmatprep.subr.bf16.mxu1 %v2613_v20  ;;  %2399 = vmatprep.subr.bf16.mxu0 %v2632_v38  ;;  %v2635_v20 = vld [vmem:[%s3353_s4 + $0x100] sm:$0xff]  }
  0x31   : > { %2352 = vmatpush3.bf16.msra.mxu1 %v2615_v21  ;;  %2400 = vmatpush3.bf16.msra.mxu0 %v2633_v39  ;;  %v2638_v39 = vld [vmem:[%s3353_s4 + $0x180] sm:$0xff]  }
  0x32   : > { %2353 = vmatprep.subr.bf16.mxu1 %v2617_v22  ;;  %2465 = vmatprep.subr.bf16.mxu0 %v2636_v41  ;;  %v2987_v22 = vadd.s32 32, %v2926_v44  ;;  %v2639_v41 = vld [vmem:[%s3353_s4 + $0x108] sm:$0xff]  }
  0x35   : > { %2354 = vmatpush3.bf16.msra.mxu1 %v2619_v24 }
  0x36   : > { %2355 = vmatprep.subr.bf16.mxu1 %v2621_v26 }
  0x39   : > { %2356 = vmatpush3.bf16.msra.mxu1 %v2623_v28 }
  0x3a   : > { %2357 = vmatprep.subr.bf16.mxu1 %v2625_v31 }
  0x3d   : > { %2358 = vmatpush3.bf16.msra.mxu1 %v2627_v33 }
  0x3e   : > { %2359 = vmatprep.subr.bf16.mxu1 %v2629_v35 }
  0x41   : > { %2360 = vmatpush3.bf16.msra.mxu1 %v2631_v37  ;;  %v2675_v37 = vld [vmem:[%s3355_s6] sm:$0xff]  }
  0x42   : > { %2425 = vmatprep.subr.bf16.mxu1 %v2634_v40  ;;  %v2676_v40 = vld [vmem:[%s3355_s6 + $0x48] sm:$0xff]  }
  0xf7   : > { %v2561_v45 = vpop.f32.mrb[0].mxu1 }
  0xf8   : > { %v501_v46 = vadd.f32 %v2561_v45, %v2168_v43  ;;  %v492_v47 = vpop.f32.mrb[1].mxu1  ;;  %v599_v45 = vand.u32 7, %v2990_v23  ;;  %v2653_v23 = vld [vmem:[%s3353_s4 + $0x168] sm:$0xff]  }
  0xf9   : > { %v493_v48 = vadd.f32 %v2168_v43, %v492_v47  ;;  %v2562_v49 = vpop.f32.mrb[2].mxu1 }
  0xfa   : > { %v2929_v51 = vmax.f32 %v501_v46, 0.0  ;;  %v504_v52 = vadd.f32 %v2562_v49, %v2168_v43  ;;  %v495_v53 = vpop.f32.mrb[3].mxu1  ;;  %vm669_vm14 = vcmp.gt.s32.totalorder %v599_v45, 0  ;;  %vm717_vm2 = vcmp.lt.s32.totalorder %v599_v45, 7  ;;  %v2660_v45 = vld [vmem:[%s3353_s4 + $0x1f0] sm:$0xff]  }
  0xfb   : > { %v2931_v54 = vmax.f32 %v493_v48, 0.0  ;;  %v496_v55 = vadd.f32 %v2168_v43, %v495_v53  ;;  %v2641_v48 = vld [vmem:[%s3353_s4 + $0x150] sm:$0xff]  }
  0xfc   : > { %545 = vst [vmem:[#allocation3 + $0x20] sm:$0xff] %v2929_v51  ;;  %v2934_v56 = vmax.f32 %v504_v52, 0.0  ;;  %v2643_v53 = vld [vmem:[%s3353_s4 + $0x110] sm:$0xff]   ;;  %v2661_v52 = vld [vmem:[%s3353_s4 + $0x178] sm:$0xff]  }
  0xfd   : > { %543 = vst [vmem:[#allocation3 + $0x10] sm:$0xff] %v2931_v54  ;;  %v2941_v59 = vmax.f32 %v496_v55, 0.0  ;;  %v696_v60 = vpack.c.bf16 %v2931_v54, %v2699_v29  ;;  %v2644_v55 = vld [vmem:[%s3353_s4 + $0x1d0] sm:$0xff]  }
  0xfe   : > { %546 = vst [vmem:[#allocation3 + $0x28] sm:$0xff] %v2934_v56  ;;  %v769_v63 = vpack.c.bf16 %v2934_v56, %v2929_v51 }
  0xff   : > { %544 = vst [vmem:[#allocation3 + $0x18] sm:$0xff] %v2941_v59  ;;  %v2565_v0 = vpop.f32.mrb[4].mxu1  ;;  %1515 = vmatprep.mubr.bf16.mxu1 %v696_v60  ;;  %v2954_v1 = vpack.c.bf16 %v2929_v51, %v2941_v59  ;;  %v768_v2 = vpack.c.bf16 %v2941_v59, %v2931_v54  ;;  %v2669_v54 = vld [vmem:[%s3353_s4 + $0x218] sm:$0xff]   ;;  %v2671_v51 = vld [vmem:[%s3353_s4 + $0x228] sm:$0xff]  }
 0x100   : > { %v517_v3 = vadd.f32 %v2565_v0, %v2168_v43  ;;  %v508_v4 = vpop.f32.mrb[5].mxu1  ;;  %v559_v0 = vadd.s32 56, %v2926_v44  ;;  %v2646_v44 = vld [vmem:[%s3353_s4 + $0x190] sm:$0xff]  }
 0x101   : > { %v509_v6 = vadd.f32 %v2168_v43, %v508_v4  ;;  %v2566_v7 = vpop.f32.mrb[6].mxu1 }
 0x102   : > { %v2960_v9 = vmax.f32 %v517_v3, 0.0  ;;  %v520_v10 = vadd.f32 %v2566_v7, %v2168_v43  ;;  %v511_v11 = vpop.f32.mrb[7].mxu1  ;;  %v613_v15 = vand.u32 7, %v559_v0  ;;  %v2666_v0 = vld [vmem:[%s3353_s4 + $0x200] sm:$0xff]   ;;  %v2681_v3 = vld [vmem:[%s3355_s6 + $0x18] sm:$0xff]  }
 0x103   : > { %v2962_v13 = vmax.f32 %v509_v6, 0.0  ;;  %v512_v14 = vadd.f32 %v2168_v43, %v511_v11  ;;  %v592_v43 = vand.u32 7, %v2987_v22  ;;  %v2652_v22 = vld [vmem:[%s3353_s4 + $0x1e0] sm:$0xff]  }
 0x104   : > { %549 = vst [vmem:[#allocation3 + $0x40] sm:$0xff] %v2960_v9  ;;  %v2973_v17 = vmax.f32 %v520_v10, 0.0  ;;  %v657_v18 = vld [vmem:[#allocation3 + $0xf] sm:$0xff]  ;;  %v2648_v10 = vld [vmem:[%s3353_s4 + $0x1d8] sm:$0xff]   ;;  %vm671_vm4 = vcmp.gt.s32.totalorder %v613_v15, 0  ;;  %vm719_vm11 = vcmp.lt.s32.totalorder %v613_v15, 7 }
 0x105   : > { %547 = vst [vmem:[#allocation3 + $0x30] sm:$0xff] %v2962_v13  ;;  %v2993_v24 = vmax.f32 %v512_v14, 0.0  ;;  %v2269_v25 = vpack.c.bf16 %v657_v18, %v656_v12  ;;  %v704_v26 = vld [vmem:[#allocation3 + $0x9] sm:$0xff]  ;;  %v3006_v31 = vpack.c.bf16 %v2962_v13, %v2934_v56  ;;  %vm668_vm13 = vcmp.gt.s32.totalorder %v592_v43, 0  ;;  %v3078_v60 = vld [vmem:[#allocation3 + $0x21] sm:$0xff]  ;;  %v2689_v15 = vld [vmem:[%s3355_s6 + $0x38] sm:$0xff]  }
 0x106   : > { %v2999_v28 = vld [vmem:[#allocation3 + $0x27] sm:$0xff]  ;;  %550 = vst [vmem:[#allocation3 + $0x48] sm:$0xff] %v2973_v17  ;;  %v737_v32 = vld [vmem:[#allocation3 + $0x17] sm:$0xff]  ;;  %v738_v34 = vld [vmem:[#allocation3 + $0x1f] sm:$0xff]  ;;  %v771_v35 = vpack.c.bf16 %v2973_v17, %v2960_v9  ;;  %v606_v14 = vand.u32 7, %v558_v62  ;;  %vm716_vm1 = vcmp.lt.s32.totalorder %v592_v43, 7 }
 0x107   : > { %v3009_v33 = vld [vmem:[#allocation3 + $0x11] sm:$0xff]  ;;  %548 = vst [vmem:[#allocation3 + $0x38] sm:$0xff] %v2993_v24  ;;  %2270 = vmatmul.mubr.msk.bf16.vlgmr.msra.gmra.mrb[8].mxu1 %vm2975_vm6, %v2269_v25  ;;  %v2281_v36 = vpack.c.bf16 %v737_v32, %v657_v18  ;;  %v3047_v46 = vpack.c.bf16 %v2960_v9, %v2993_v24  ;;  %v2287_v47 = vpack.c.bf16 %v2999_v28, %v738_v34  ;;  %v3076_v58 = vld [vmem:[#allocation3 + $0x19] sm:$0xff]  ;;  %vm3094_vm0 = vmpackc.low %vm669_vm14, %vm668_vm13 }
 0x108   : > { %v2284_v38 = vpack.c.bf16 %v3009_v33, %v704_v26  ;;  %2426 = vmatpush3.bf16.msra.mxu1 %v2635_v20  ;;  %1523 = vmatprep.mubr.bf16.mxu1 %v2954_v1  ;;  %v770_v49 = vpack.c.bf16 %v2993_v24, %v2962_v13  ;;  %v3074_v57 = vpack.c.bf16 %v738_v34, %v737_v32  ;;  %v2649_v12 = vld [vmem:[%s3353_s4 + $0x160] sm:$0xff]   ;;  %vm670_vm3 = vcmp.gt.s32.totalorder %v606_v14, 0  ;;  %vm3142_vm5 = vmpackc.low %vm717_vm2, %vm716_vm1  ;;  %v2659_v43 = vld [vmem:[%s3353_s4 + $0x130] sm:$0xff]  }
 0x109   : > { %2282 = vmatprep.mubr.msk.bf16.mxu0 %vm2975_vm6, %v2281_v36  ;;  %2427 = vmatprep.subr.bf16.mxu1 %v2637_v30  ;;  %v3104_v6 = vpack.c.bf16 %v3078_v60, %v3076_v58  ;;  %v2651_v18 = vld [vmem:[%s3353_s4 + $0x120] sm:$0xff]   ;;  %vm3153_vm7 = vmpackc.low %vm671_vm4, %vm670_vm3  ;;  %v2655_v36 = vld [vmem:[%s3353_s4 + $0x128] sm:$0xff]   ;;  %vm718_vm8 = vcmp.lt.s32.totalorder %v606_v14, 7 }
 0x10a   : > { %2285 = vmatmul.mubr.msk.bf16.vlgmr.msra.gmra.mrb[0].mxu0 %vm3020_vm9, %v2284_v38  ;;  %v2654_v30 = vld [vmem:[%s3353_s4 + $0x1a0] sm:$0xff]   ;;  %v2656_v38 = vld [vmem:[%s3353_s4 + $0x1e8] sm:$0xff]   ;;  %vm3188_vm12 = vmpackc.low %vm719_vm11, %vm718_vm8 }
 0x10b   : > { %2288 = vmatprep.mubr.msk.bf16.mxu0 %vm3033_vm10, %v2287_v47  ;;  %2466 = vmatpush3.bf16.msra.mxu0 %v2638_v39  ;;  %v2673_v24 = vld [vmem:[%s3353_s4 + $0x238] sm:$0xff]  }
 0x10c   : > { %2428 = vmatpush3.bf16.msra.mxu1 %v2639_v41  ;;  %2467 = vmatprep.subr.bf16.mxu0 %v2640_v42  ;;  %v740_v7 = vld [vmem:[#allocation3 + $0x2f] sm:$0xff]  ;;  %v2688_v14 = vld [vmem:[%s3355_s6 + $0x78] sm:$0xff]  }
 0x10d   : > { %2429 = vmatprep.subr.bf16.mxu1 %v2641_v48  ;;  %v3127_v20 = vpack.c.bf16 %v740_v7, %v2999_v28  ;;  %v3137_v26 = vld [vmem:[#allocation3 + $0x47] sm:$0xff]  ;;  %v2657_v41 = vld [vmem:[%s3353_s4 + $0x170] sm:$0xff]  }
 0x10e   : > { %v741_v4 = vld [vmem:[#allocation3 + $0x37] sm:$0xff]  ;;  %v742_v25 = vld [vmem:[#allocation3 + $0x3f] sm:$0xff]  ;;  %v708_v27 = vld [vmem:[#allocation3 + $0x29] sm:$0xff] }
 0x10f   : > { %2468 = vmatpush3.bf16.msra.mxu0 %v2642_v50  ;;  %2273 = vmatmul.mubr.msk.bf16.gmra.mrb[12].mxu1 %vm3033_vm10, %v3074_v57  ;;  %v2293_v11 = vpack.c.bf16 %v741_v4, %v740_v7  ;;  %v3129_v21 = vld [vmem:[#allocation3 + $0x31] sm:$0xff]  ;;  %v2299_v39 = vpack.c.bf16 %v3137_v26, %v742_v25  ;;  %v2658_v42 = vld [vmem:[%s3353_s4 + $0x1a8] sm:$0xff]   ;;  %v2278_v47 = vpack.c.bf16 %v742_v25, %v741_v4  ;;  %v710_v48 = vld [vmem:[#allocation3 + $0x39] sm:$0xff] }
 0x110   : > { %2430 = vmatpush3.bf16.msra.mxu1 %v2643_v53  ;;  %1531 = vmatprep.mubr.bf16.mxu1 %v3006_v31  ;;  %v3151_v32 = vpack.c.bf16 %v3129_v21, %v708_v27  ;;  %v711_v50 = vld [vmem:[#allocation3 + $0x41] sm:$0xff]  ;;  %v2305_v53 = vpack.c.bf16 %v3076_v58, %v3009_v33  ;;  %v2663_v33 = vld [vmem:[%s3353_s4 + $0x138] sm:$0xff]   ;;  %v2308_v7 = vpack.c.bf16 %v708_v27, %v3078_v60  ;;  %v783_v19 = vld [vmem:[#allocation3 + $0x49] sm:$0xff] }
 0x111   : > { %2469 = vmatprep.subr.bf16.mxu0 %v2644_v55  ;;  %2431 = vmatprep.subr.bf16.mxu1 %v2645_v61  ;;  %v2662_v61 = vld [vmem:[%s3353_s4 + $0x1b0] sm:$0xff]   ;;  %v2302_v62 = vpack.c.bf16 %v711_v50, %v710_v48  ;;  %v2664_v58 = vld [vmem:[%s3353_s4 + $0x1f8] sm:$0xff]   ;;  %v2311_v59 = vpack.c.bf16 %v710_v48, %v3129_v21  ;;  %v2314_v56 = vpack.c.bf16 %v783_v19, %v711_v50 }
 0x112   : > { %2291 = vmatmul.mubr.msk.bf16.gmra.mrb[4].mxu0 %vm3087_vm15, %v3104_v6  ;;  %v2665_v4 = vld [vmem:[%s3353_s4 + $0x1b8] sm:$0xff]   ;;  %v807_v13 = vld [vmem:[#allocation3 + $0x4f] sm:$0xff] }
 0x113   : > { %2294 = vmatprep.mubr.msk.bf16.mxu0 %vm3094_vm0, %v2293_v11  ;;  %2470 = vmatpush3.bf16.msra.mxu0 %v2646_v44  ;;  %v2667_v44 = vld [vmem:[%s3353_s4 + $0x208] sm:$0xff]   ;;  %v847_v9 = vld [vmem:[#allocation3 + $0x51] sm:$0xff] }
 0x114   : > { %2432 = vmatpush3.bf16.msra.mxu1 %v2647_v8  ;;  %2471 = vmatprep.subr.bf16.mxu0 %v2648_v10  ;;  %v2680_v60 = vld [vmem:[%s3355_s6 + $0x58] sm:$0xff]   ;;  %v2684_v8 = vld [vmem:[%s3355_s6 + $0x68] sm:$0xff]   ;;  %v2686_v11 = vld [vmem:[%s3355_s6 + $0x70] sm:$0xff]  }
 0x115   : > { %2433 = vmatprep.subr.bf16.mxu1 %v2649_v12  ;;  %v2685_v10 = vld [vmem:[%s3355_s6 + $0x28] sm:$0xff]   ;;  %v2687_v12 = vld [vmem:[%s3355_s6 + $0x30] sm:$0xff]  }
 0x117   : > { %2472 = vmatpush3.bf16.msra.mxu0 %v2650_v16  ;;  %2276 = vmatmul.mubr.msk.bf16.gmra.mrb[16].mxu1 %vm3094_vm0, %v3127_v20  ;;  %v1837_v16 = vld [vmem:[#allocation5 + $0x8] sm:$0xff] }
 0x118   : > { %2434 = vmatpush3.bf16.msra.mxu1 %v2651_v18  ;;  %1539 = vmatprep.mubr.bf16.mxu1 %v3047_v46 }
 0x119   : > { %2473 = vmatprep.subr.bf16.mxu0 %v2652_v22  ;;  %2435 = vmatprep.subr.bf16.mxu1 %v2653_v23 }
 0x11a   : > { %2297 = vmatmul.mubr.msk.bf16.gmra.mrb[8].mxu0 %vm3142_vm5, %v3151_v32 }
 0x11b   : > { %2300 = vmatprep.mubr.msk.bf16.mxu0 %vm3153_vm7, %v2299_v39  ;;  %2474 = vmatpush3.bf16.msra.mxu0 %v2654_v30 }
 0x11c   : > { %2436 = vmatpush3.bf16.msra.mxu1 %v2655_v36  ;;  %2475 = vmatprep.subr.bf16.mxu0 %v2656_v38 }
 0x11d   : > { %2437 = vmatprep.subr.bf16.mxu1 %v2657_v41 }
 0x11f   : > { %2476 = vmatpush3.bf16.msra.mxu0 %v2658_v42  ;;  %2279 = vmatmul.mubr.msk.bf16.gmra.mrb[20].mxu1 %vm3153_vm7, %v2278_v47 }
 0x120   : > { %2438 = vmatpush3.bf16.msra.mxu1 %v2659_v43  ;;  %2306 = vmatprep.mubr.msk.bf16.mxu1 %vm3020_vm9, %v2305_v53 }
 0x121   : > { %2477 = vmatprep.subr.bf16.mxu0 %v2660_v45  ;;  %2439 = vmatprep.subr.bf16.mxu1 %v2661_v52 }
 0x122   : > { %2303 = vmatmul.mubr.msk.bf16.gmra.mrb[12].mxu0 %vm3188_vm12, %v2302_v62 }
 0x123   : > { %2478 = vmatpush3.bf16.msra.mxu0 %v2662_v61  ;;  %1710 = vmatprep.mubr.bf16.mxu0 %v2954_v1  ;;  %v2668_v1 = vld [vmem:[%s3353_s4 + $0x210] sm:$0xff]  }
 0x124   : > { %2440 = vmatpush3.bf16.msra.mxu1 %v2663_v33  ;;  %2479 = vmatprep.subr.bf16.mxu0 %v2664_v58 }
 0x125   : > { %2567 = vmatprep.subr.bf16.mxu1 %v2666_v0 }
 0x127   : > { %2480 = vmatpush3.bf16.msra.mxu0 %v2665_v4  ;;  %1646 = vmatmul.mubr.bf16.vlgmr.msra.gmra.mrb[24].mxu1 %v768_v2  ;;  %v2670_v2 = vld [vmem:[%s3353_s4 + $0x220] sm:$0xff]  }
 0x128   : > { %2568 = vmatpush3.bf16.msra.mxu1 %v2666_v0  ;;  %2309 = vmatprep.mubr.msk.bf16.mxu1 %vm3087_vm15, %v2308_v7 }
 0x129   : > { %2569 = vmatprep.subr.bf16.mxu1 %v2667_v44 }
 0x12a   : > { %2318 = vmatmul.mubr.msk.bf16.vlgmr.msra.gmra.mrb[16].mxu0 %vm2975_vm6, %v3074_v57  ;;  %v2679_v57 = vld [vmem:[%s3355_s6 + $0x10] sm:$0xff]  }
 0x12b   : > { %1718 = vmatprep.mubr.bf16.mxu0 %v3006_v31  ;;  %v2672_v31 = vld [vmem:[%s3353_s4 + $0x230] sm:$0xff]  }
 0x12c   : > { %2570 = vmatpush3.bf16.msra.mxu1 %v2667_v44 }
 0x12d   : > { %2571 = vmatprep.subr.bf16.mxu1 %v2668_v1 }
 0x12f   : > { %1654 = vmatmul.mubr.bf16.gmra.mrb[28].mxu1 %v769_v63  ;;  %v835_v63 = vpack.c.bf16 %v2699_v29, %v2973_v17  ;;  %v2326_v29 = vpack.c.bf16 %v807_v13, %v3137_v26  ;;  %v2338_v17 = vpack.c.bf16 %v847_v9, %v783_v19 }
 0x130   : > { %2572 = vmatpush3.bf16.msra.mxu1 %v2668_v1  ;;  %2312 = vmatprep.mubr.msk.bf16.mxu1 %vm3142_vm5, %v2311_v59 }
 0x131   : > { %2573 = vmatprep.subr.bf16.mxu1 %v2669_v54 }
 0x132   : > { %2321 = vmatmul.mubr.msk.bf16.gmra.mrb[20].mxu0 %vm3033_vm10, %v3127_v20  ;;  %v2173_v20 = vld [vmem:[%s3354_s5] ss:$0 sm:$0xff] }
 0x133   : > { %1726 = vmatprep.mubr.bf16.mxu0 %v3047_v46  ;;  %v2677_v46 = vld [vmem:[%s3355_s6 + $0x8] sm:$0xff]  }
 0x134   : > { %2574 = vmatpush3.bf16.msra.mxu1 %v2669_v54 }
 0x135   : > { %2575 = vmatprep.subr.bf16.mxu1 %v2670_v2 }
 0x137   : > { %1662 = vmatmul.mubr.bf16.gmra.mrb[32].mxu1 %v770_v49  ;;  %v2678_v49 = vld [vmem:[%s3355_s6 + $0x50] sm:$0xff]  }
 0x138   : > { %2576 = vmatpush3.bf16.msra.mxu1 %v2670_v2  ;;  %2315 = vmatprep.mubr.msk.bf16.mxu1 %vm3188_vm12, %v2314_v56 }
 0x139   : > { %2577 = vmatprep.subr.bf16.mxu1 %v2671_v51 }
 0x13a   : > { %2324 = vmatmul.mubr.msk.bf16.gmra.mrb[24].mxu0 %vm3094_vm0, %v2278_v47 }
 0x13b   : > { %1734 = vmatprep.mubr.bf16.mxu0 %v835_v63 }
 0x13c   : > { %2578 = vmatpush3.bf16.msra.mxu1 %v2671_v51 }
 0x13d   : > { %2579 = vmatprep.subr.bf16.mxu1 %v2672_v31 }
 0x13f   : > { %1670 = vmatmul.mubr.bf16.gmra.mrb[36].mxu1 %v771_v35  ;;  %v2674_v35 = vld [vmem:[%s3355_s6 + $0x40] sm:$0xff]  }
 0x140   : > { %2580 = vmatpush3.bf16.msra.mxu1 %v2672_v31  ;;  %2583 = vmatprep.mubr.msk.bf16.mxu1 %vm3020_vm9, %v3104_v6  ;;  %v2683_v6 = vld [vmem:[%s3355_s6 + $0x20] sm:$0xff]  }
 0x141   : > { %2581 = vmatprep.subr.bf16.mxu1 %v2673_v24  ;;  %2517 = vmatprep.subr.bf16.mxu0 %v2674_v35 }
 0x142   : > { %2327 = vmatmul.mubr.msk.bf16.gmra.mrb[28].mxu0 %vm3153_vm7, %v2326_v29 }
 0x143   : > { %2518 = vmatpush3.bf16.msra.mxu0 %v2675_v37  ;;  %2011 = vmatprep.mubr.bf16.mxu0 %v1837_v16 }
 0x144   : > { %2582 = vmatpush3.bf16.msra.mxu1 %v2673_v24  ;;  %2519 = vmatprep.subr.bf16.mxu0 %v2676_v40 }
 0x147   : > { %2584 = vmatmul.mubr.msk.bf16.vlgmr.msra.gmra.mrb[40].mxu1 %vm3087_vm15, %v3151_v32  ;;  %2520 = vmatpush3.bf16.msra.mxu0 %v2677_v46 }
 0x148   : > { %2587 = vmatprep.mubr.msk.bf16.mxu1 %vm3142_vm5, %v2302_v62  ;;  %2521 = vmatprep.subr.bf16.mxu0 %v2678_v49 }
 0x14b   : > { %2522 = vmatpush3.bf16.msra.mxu0 %v2679_v57 }
 0x14c   : > { %2523 = vmatprep.subr.bf16.mxu0 %v2680_v60 }
 0x14f   : > { %2588 = vmatmul.mubr.msk.bf16.gmra.mrb[44].mxu1 %vm3188_vm12, %v2338_v17  ;;  %2524 = vmatpush3.bf16.msra.mxu0 %v2681_v3 }
 0x150   : > { %2525 = vmatprep.subr.bf16.mxu0 %v2682_v5 }
 0x153   : > { %2526 = vmatpush3.bf16.msra.mxu0 %v2683_v6 }
 0x154   : > { %2527 = vmatprep.subr.bf16.mxu0 %v2684_v8 }
 0x157   : > { %2528 = vmatpush3.bf16.msra.mxu0 %v2685_v10 }
 0x158   : > { %2529 = vmatprep.subr.bf16.mxu0 %v2686_v11 }
 0x15b   : > { %2530 = vmatpush3.bf16.msra.mxu0 %v2687_v12 }
 0x15c   : > { %2531 = vmatprep.subr.bf16.mxu0 %v2688_v14 }
 0x15f   : > { %2532 = vmatpush3.bf16.msra.mxu0 %v2689_v15 }
 0x1da   : > { %v2361_v18 = vpop.f32.mrb[8].mxu1 }
 0x1db   : > { %v2362_v21 = vpop.f32.mrb[9].mxu1 }
 0x1dc   : > { %v2363_v22 = vadd.f32 %v2362_v21, %v2361_v18  ;;  %v2364_v23 = vpop.f32.mrb[10].mxu1 }
 0x1dd   : > { %v2401_v25 = vpop.f32.mrb[0].mxu0  ;;  %v2365_v26 = vpop.f32.mrb[11].mxu1 }
 0x1de   : > { %v1518_v27 = vadd.f32 %v2363_v22, %v2173_v20  ;;  %v2366_v28 = vadd.f32 %v2365_v26, %v2364_v23  ;;  %v2402_v30 = vpop.f32.mrb[1].mxu0 }
 0x1df   : > { %v2403_v32 = vadd.f32 %v2402_v30, %v2401_v25  ;;  %v2404_v34 = vpop.f32.mrb[2].mxu0 }
 0x1e0   : > { %v1521_v36 = vadd.f32 %v2366_v28, %v2173_v20  ;;  %v2405_v38 = vpop.f32.mrb[3].mxu0 }
 0x1e1   : > { %v1583_v39 = vadd.f32 %v2403_v32, %v1518_v27  ;;  %v2406_v41 = vadd.f32 %v2405_v38, %v2404_v34 }
 0x1e2   : > { %v2367_v42 = vpop.f32.mrb[12].mxu1 }
 0x1e3   : > { %v1586_v43 = vadd.f32 %v2406_v41, %v1521_v36  ;;  %v2368_v45 = vpop.f32.mrb[13].mxu1 }
 0x1e4   : > { %v2369_v47 = vadd.f32 %v2368_v45, %v2367_v42  ;;  %v2370_v48 = vpop.f32.mrb[14].mxu1 }
 0x1e5   : > { %v2407_v50 = vpop.f32.mrb[4].mxu0  ;;  %v2371_v52 = vpop.f32.mrb[15].mxu1 }
 0x1e6   : > { %v1526_v53 = vadd.f32 %v2369_v47, %v2173_v20  ;;  %v2372_v55 = vadd.f32 %v2371_v52, %v2370_v48  ;;  %v2408_v61 = vpop.f32.mrb[5].mxu0 }
 0x1e7   : > { %v2409_v62 = vadd.f32 %v2408_v61, %v2407_v50  ;;  %v2410_v33 = vpop.f32.mrb[6].mxu0 }
 0x1e8   : > { %v1529_v58 = vadd.f32 %v2372_v55, %v2173_v20  ;;  %v2411_v0 = vpop.f32.mrb[7].mxu0 }
 0x1e9   : > { %v1591_v4 = vadd.f32 %v2409_v62, %v1526_v53  ;;  %v2412_v44 = vadd.f32 %v2411_v0, %v2410_v33 }
 0x1ea   : > { %v2373_v7 = vpop.f32.mrb[16].mxu1 }
 0x1eb   : > { %v1594_v1 = vadd.f32 %v2412_v44, %v1529_v58  ;;  %v2374_v54 = vpop.f32.mrb[17].mxu1 }
 0x1ec   : > { %v2375_v59 = vadd.f32 %v2374_v54, %v2373_v7  ;;  %v2376_v2 = vpop.f32.mrb[18].mxu1 }
 0x1ed   : > { %v2413_v19 = vpop.f32.mrb[8].mxu0  ;;  %v2377_v51 = vpop.f32.mrb[19].mxu1 }
 0x1ee   : > { %v1534_v56 = vadd.f32 %v2375_v59, %v2173_v20  ;;  %v2378_v63 = vadd.f32 %v2377_v51, %v2376_v2  ;;  %v2414_v31 = vpop.f32.mrb[9].mxu0 }
 0x1ef   : > { %v2415_v13 = vadd.f32 %v2414_v31, %v2413_v19  ;;  %v2416_v24 = vpop.f32.mrb[10].mxu0 }
 0x1f0   : > { %v1537_v29 = vadd.f32 %v2378_v63, %v2173_v20  ;;  %v2417_v9 = vpop.f32.mrb[11].mxu0 }
 0x1f1   : > { %v1599_v17 = vadd.f32 %v2415_v13, %v1534_v56  ;;  %v2418_v35 = vadd.f32 %v2417_v9, %v2416_v24 }
 0x1f2   : > { %v2379_v37 = vpop.f32.mrb[20].mxu1 }
 0x1f3   : > { %v1602_v40 = vadd.f32 %v2418_v35, %v1537_v29  ;;  %v2380_v46 = vpop.f32.mrb[21].mxu1 }
 0x1f4   : > { %v2381_v49 = vadd.f32 %v2380_v46, %v2379_v37  ;;  %v2382_v57 = vpop.f32.mrb[22].mxu1 }
 0x1f5   : > { %v2419_v60 = vpop.f32.mrb[12].mxu0  ;;  %v2383_v3 = vpop.f32.mrb[23].mxu1 }
 0x1f6   : > { %v1542_v5 = vadd.f32 %v2381_v49, %v2173_v20  ;;  %v2384_v6 = vadd.f32 %v2383_v3, %v2382_v57  ;;  %v2420_v8 = vpop.f32.mrb[13].mxu0 }
 0x1f7   : > { %v2421_v10 = vadd.f32 %v2420_v8, %v2419_v60  ;;  %v2422_v11 = vpop.f32.mrb[14].mxu0 }
 0x1f8   : > { %v1545_v12 = vadd.f32 %v2384_v6, %v2173_v20  ;;  %v2423_v14 = vpop.f32.mrb[15].mxu0 }
 0x1f9   : > { %v1607_v15 = vadd.f32 %v2421_v10, %v1542_v5  ;;  %v2424_v16 = vadd.f32 %v2423_v14, %v2422_v11 }
 0x1fa   : > { %v2441_v18 = vpop.f32.mrb[24].mxu1 }
 0x1fb   : > { %v1610_v21 = vadd.f32 %v2424_v16, %v1545_v12  ;;  %v2442_v22 = vpop.f32.mrb[25].mxu1 }
 0x1fc   : > { %v2443_v23 = vadd.f32 %v2442_v22, %v2441_v18  ;;  %v2444_v25 = vpop.f32.mrb[26].mxu1 }
 0x1fd   : > { %v2481_v26 = vpop.f32.mrb[16].mxu0  ;;  %v2445_v27 = vpop.f32.mrb[27].mxu1 }
 0x1fe   : > { %v1648_v28 = vadd.f32 %v2443_v23, %v1583_v39  ;;  %v2446_v30 = vadd.f32 %v2445_v27, %v2444_v25  ;;  %v2482_v32 = vpop.f32.mrb[17].mxu0 }
 0x1ff   : > { %v2483_v34 = vadd.f32 %v2482_v32, %v2481_v26  ;;  %v2484_v36 = vpop.f32.mrb[18].mxu0 }
 0x200   : > { %v1651_v38 = vadd.f32 %v2446_v30, %v1586_v43  ;;  %v2485_v41 = vpop.f32.mrb[19].mxu0 }
 0x201   : > { %v2486_v42 = vadd.f32 %v2485_v41, %v2484_v36  ;;  %v1713_v45 = vadd.f32 %v2483_v34, %v1648_v28 }
 0x202   : > { %v2447_v20 = vpop.f32.mrb[28].mxu1 }
 0x203   : > { %v2448_v47 = vpop.f32.mrb[29].mxu1  ;;  %v1716_v48 = vadd.f32 %v2486_v42, %v1651_v38 }
 0x204   : > { %v2449_v50 = vadd.f32 %v2448_v47, %v2447_v20  ;;  %v2450_v52 = vpop.f32.mrb[30].mxu1 }
 0x205   : > { %v2487_v53 = vpop.f32.mrb[20].mxu0  ;;  %v2451_v55 = vpop.f32.mrb[31].mxu1 }
 0x206   : > { %v1656_v61 = vadd.f32 %v2449_v50, %v1591_v4  ;;  %v2452_v62 = vadd.f32 %v2451_v55, %v2450_v52  ;;  %v2488_v33 = vpop.f32.mrb[21].mxu0 }
 0x207   : > { %v2489_v58 = vadd.f32 %v2488_v33, %v2487_v53  ;;  %v2490_v39 = vpop.f32.mrb[22].mxu0 }
 0x208   : > { %v1659_v0 = vadd.f32 %v2452_v62, %v1594_v1  ;;  %v2491_v44 = vpop.f32.mrb[23].mxu0 }
 0x209   : > { %v2492_v7 = vadd.f32 %v2491_v44, %v2490_v39  ;;  %v1721_v54 = vadd.f32 %v2489_v58, %v1656_v61 }
 0x20a   : > { %v2453_v43 = vpop.f32.mrb[32].mxu1 }
 0x20b   : > { %v2454_v59 = vpop.f32.mrb[33].mxu1  ;;  %v1724_v2 = vadd.f32 %v2492_v7, %v1659_v0  ;;  %v1841_v7 = vld [vmem:[#allocation5 + $0x28] sm:$0xff] }
 0x20c   : > { %v2455_v19 = vadd.f32 %v2454_v59, %v2453_v43  ;;  %v2456_v51 = vpop.f32.mrb[34].mxu1  ;;  %v2246_v59 = vld [vmem:[%s3356_s7] ss:$0 sm:$0xff] }
 0x20d   : > { %v2493_v56 = vpop.f32.mrb[24].mxu0  ;;  %v2457_v63 = vpop.f32.mrb[35].mxu1 }
 0x20e   : > { %v1664_v31 = vadd.f32 %v2455_v19, %v1599_v17  ;;  %v2458_v13 = vadd.f32 %v2457_v63, %v2456_v51  ;;  %v2494_v24 = vpop.f32.mrb[25].mxu0 }
 0x20f   : > { %v2495_v29 = vadd.f32 %v2494_v24, %v2493_v56  ;;  %v2496_v4 = vpop.f32.mrb[26].mxu0 }
 0x210   : > { %v1667_v9 = vadd.f32 %v2458_v13, %v1602_v40  ;;  %v2497_v35 = vpop.f32.mrb[27].mxu0 }
 0x211   : > { %v2498_v37 = vadd.f32 %v2497_v35, %v2496_v4  ;;  %v1729_v46 = vadd.f32 %v2495_v29, %v1664_v31 }
 0x212   : > { %v2459_v1 = vpop.f32.mrb[36].mxu1 }
 0x213   : > { %v2460_v49 = vpop.f32.mrb[37].mxu1  ;;  %v1732_v57 = vadd.f32 %v2498_v37, %v1667_v9 }
 0x214   : > { %v2461_v60 = vadd.f32 %v2460_v49, %v2459_v1  ;;  %v2462_v3 = vpop.f32.mrb[38].mxu1 }
 0x215   : > { %v2499_v5 = vpop.f32.mrb[28].mxu0  ;;  %v2463_v6 = vpop.f32.mrb[39].mxu1 }
 0x216   : > { %v1672_v8 = vadd.f32 %v2461_v60, %v1607_v15  ;;  %v2464_v10 = vadd.f32 %v2463_v6, %v2462_v3  ;;  %v2500_v11 = vpop.f32.mrb[29].mxu0 }
 0x217   : > { %v2501_v12 = vadd.f32 %v2500_v11, %v2499_v5  ;;  %v2502_v17 = vpop.f32.mrb[30].mxu0 }
 0x218   : > { %v1675_v14 = vadd.f32 %v2464_v10, %v1610_v21  ;;  %v2503_v16 = vpop.f32.mrb[31].mxu0  ;;  %v1839_v21 = vld [vmem:[#allocation5 + $0x18] sm:$0xff] }
 0x219   : > { %v2504_v18 = vadd.f32 %v2503_v16, %v2502_v17  ;;  %v1737_v22 = vadd.f32 %v2501_v12, %v1672_v8 }
 0x21a   : > { %v2585_v40 = vpop.f32.mrb[40].mxu1 }
 0x21b   : > { %v1786_v23 = vadd.f32 %v2585_v40, %v1721_v54  ;;  %v1777_v25 = vpop.f32.mrb[41].mxu1  ;;  %v1740_v26 = vadd.f32 %v2504_v18, %v1675_v14  ;;  %v1843_v54 = vld [vmem:[#allocation5 + $0x38] sm:$0xff] }
 0x21c   : > { %v1778_v27 = vadd.f32 %v1777_v25, %v1713_v45  ;;  %v2586_v28 = vpop.f32.mrb[42].mxu1 }
 0x21d   : > { %v1789_v30 = vadd.f32 %v2586_v28, %v1724_v2  ;;  %v1780_v32 = vpop.f32.mrb[43].mxu1  ;;  %v1810_v36 = vmax.f32 %v1786_v23, 0.0 }
 0x21e   : > { %v1781_v34 = vadd.f32 %v1780_v32, %v1716_v48  ;;  %v1808_v15 = vmax.f32 %v1778_v27, 0.0 }
 0x21f   : > { %v1811_v38 = vmax.f32 %v1789_v30, 0.0 }
 0x220   : > { %v1809_v41 = vmax.f32 %v1781_v34, 0.0 }
 0x221   : > { %v1825_v42 = vpack.c.bf16 %v1811_v38, %v1810_v36 }
 0x222   : > { %v1824_v20 = vpack.c.bf16 %v1809_v41, %v1808_v15  ;;  %v2589_v47 = vpop.f32.mrb[44].mxu1 }
 0x223   : > { %v1802_v50 = vadd.f32 %v2589_v47, %v1737_v22  ;;  %v1793_v52 = vpop.f32.mrb[45].mxu1 }
 0x224   : > { %v1794_v53 = vadd.f32 %v1793_v52, %v1729_v46  ;;  %v2590_v55 = vpop.f32.mrb[46].mxu1  ;;  %2012 = vmatmul.mubr.bf16.vlgmr.msra.gmra.mrb[32].mxu0 %v1824_v20 }
 0x225   : > { %v1805_v61 = vadd.f32 %v2590_v55, %v1740_v26  ;;  %v1796_v62 = vpop.f32.mrb[47].mxu1  ;;  %2019 = vmatprep.mubr.bf16.mxu0 %v1839_v21  ;;  %v1814_v33 = vmax.f32 %v1802_v50, 0.0 }
 0x226   : > { %v1797_v45 = vadd.f32 %v1796_v62, %v1732_v57  ;;  %v1812_v58 = vmax.f32 %v1794_v53, 0.0 }
 0x227   : > { %v1815_v48 = vmax.f32 %v1805_v61, 0.0 }
 0x228   : > { %v1813_v39 = vmax.f32 %v1797_v45, 0.0 }
 0x229   : > { %v1827_v0 = vpack.c.bf16 %v1815_v48, %v1814_v33 }
 0x22a   : > { %v1826_v44 = vpack.c.bf16 %v1813_v39, %v1812_v58 }
 0x22c   : > { %2020 = vmatmul.mubr.bf16.gmra.mrb[36].mxu0 %v1825_v42 }
 0x22d   : > { %2027 = vmatprep.mubr.bf16.mxu0 %v1841_v7 }
 0x234   : > { %2028 = vmatmul.mubr.bf16.gmra.mrb[40].mxu0 %v1826_v44 }
 0x235   : > { %2035 = vmatprep.mubr.bf16.mxu0 %v1843_v54 }
 0x23c   : > { %2036 = vmatmul.mubr.bf16.gmra.mrb[44].mxu0 %v1827_v0 }
 0x2f7   : > { %v2533_v43 = vpop.f32.mrb[32].mxu0 }
 0x2f8   : > { %v2534_v2 = vpop.f32.mrb[33].mxu0 }
 0x2f9   : > { %v2535_v19 = vadd.f32 %v2534_v2, %v2533_v43  ;;  %v2536_v51 = vpop.f32.mrb[34].mxu0 }
 0x2fa   : > { %v2537_v56 = vpop.f32.mrb[35].mxu0 }
 0x2fb   : > { %v2014_v63 = vadd.f32 %v2535_v19, %v2246_v59  ;;  %v2538_v31 = vadd.f32 %v2537_v56, %v2536_v51 }
 0x2fd   : > { %v2044_v13 = vmax.f32 %v2014_v63, 0.0  ;;  %v2017_v24 = vadd.f32 %v2538_v31, %v2246_v59 }
 0x2ff   : > { %2052 = vst [vmem:[%s3336_s21] sm:$0xff] %v2044_v13  ;;  %v2045_v29 = vmax.f32 %v2017_v24, 0.0  ;;  %v2539_v4 = vpop.f32.mrb[36].mxu0 }
 0x300   : > { %v2540_v9 = vpop.f32.mrb[37].mxu0 }
 0x301   : > { %2053 = vst [vmem:[%s3336_s21 + $0x8] sm:$0xff] %v2045_v29  ;;  %v2541_v35 = vadd.f32 %v2540_v9, %v2539_v4  ;;  %v2542_v37 = vpop.f32.mrb[38].mxu0 }
 0x302   : > { %v2543_v46 = vpop.f32.mrb[39].mxu0 }
 0x303   : > { %v2022_v1 = vadd.f32 %v2541_v35, %v2246_v59  ;;  %v2544_v49 = vadd.f32 %v2543_v46, %v2542_v37 }
 0x305   : > { %v2046_v57 = vmax.f32 %v2022_v1, 0.0  ;;  %v2025_v60 = vadd.f32 %v2544_v49, %v2246_v59 }
 0x307   : > { %2054 = vst [vmem:[%s3336_s21 + $0x10] sm:$0xff] %v2046_v57  ;;  %v2047_v3 = vmax.f32 %v2025_v60, 0.0  ;;  %v2545_v5 = vpop.f32.mrb[40].mxu0 }
 0x308   : > { %v2546_v6 = vpop.f32.mrb[41].mxu0 }
 0x309   : > { %2055 = vst [vmem:[%s3336_s21 + $0x18] sm:$0xff] %v2047_v3  ;;  %v2547_v8 = vadd.f32 %v2546_v6, %v2545_v5  ;;  %v2548_v10 = vpop.f32.mrb[42].mxu0 }
 0x30a   : > { %v2549_v11 = vpop.f32.mrb[43].mxu0 }
 0x30b   : > { %v2030_v12 = vadd.f32 %v2547_v8, %v2246_v59  ;;  %v2550_v17 = vadd.f32 %v2549_v11, %v2548_v10 }
 0x30d   : > { %v2048_v14 = vmax.f32 %v2030_v12, 0.0  ;;  %v2033_v16 = vadd.f32 %v2550_v17, %v2246_v59 }
 0x30f   : > { %2056 = vst [vmem:[%s3336_s21 + $0x20] sm:$0xff] %v2048_v14  ;;  %v2049_v18 = vmax.f32 %v2033_v16, 0.0  ;;  %v2551_v22 = vpop.f32.mrb[44].mxu0 }
 0x310   : > { %v2552_v40 = vpop.f32.mrb[45].mxu0 }
 0x311   : > { %2057 = vst [vmem:[%s3336_s21 + $0x28] sm:$0xff] %v2049_v18  ;;  %v2553_v23 = vadd.f32 %v2552_v40, %v2551_v22  ;;  %v2554_v25 = vpop.f32.mrb[46].mxu0 }
 0x312   : > { %v2555_v26 = vpop.f32.mrb[47].mxu0 }
 0x313   : > { %v2038_v27 = vadd.f32 %v2553_v23, %v2246_v59  ;;  %v2556_v28 = vadd.f32 %v2555_v26, %v2554_v25 }
 0x315   : > { %v2050_v30 = vmax.f32 %v2038_v27, 0.0  ;;  %v2041_v32 = vadd.f32 %v2556_v28, %v2246_v59 }
 0x317   : > { %2058 = vst [vmem:[%s3336_s21 + $0x30] sm:$0xff] %v2050_v30  ;;  %v2051_v34 = vmax.f32 %v2041_v32, 0.0 }
 0x319   : > { %2059 = vst [vmem:[%s3336_s21 + $0x38] sm:$0xff] %v2051_v34 }
 0x31a PF: > { %s18_s27 = sadd.s32 1, %s2696_s27  }
 0x31b   : > { %p15_p4 = scmp.ge.s32.totalorder %s18_s27, 4  }
 0x31d   :  { %17 = sbr.rel (!%p15_p4) target bundleno = 1 (0x1), region = 115 }

</bundles_post_ra>
